<compile_context>
chip_gen: v6e
topology: v6e:2x2x1
jax: 0.10.0
libtpu: 0.0.40
codegen_flags: <defaults>
</compile_context>

<pallas_src>
import functools

import jax
import jax.numpy as jnp
from jax.experimental import pallas as pl
from jax.experimental.pallas import tpu as pltpu

LANE = 128


def _round_up(x, m):
    return (x + m - 1) // m * m


def _bottleneck_kernel(x_ref, w1_ref, s1_ref, b1_ref,
                       w2_ref, s2_ref, b2_ref,
                       w3_ref, s3_ref, b3_ref,
                       o_ref, pad_ref, *, H, W):
    """One grid step: B_TILE images, all three convs + BNs + ReLUs + residual."""
    B, HW, Cin = x_ref.shape                 # block (B_TILE, H*W, Cin_pad)
    P = w1_ref.shape[1]                      # planes (padded to 128)
    Cout = w3_ref.shape[1]                   # 4*planes (padded, == Cin_pad)
    rows = B * HW

    # ---- conv1 (1x1) + bn1 + relu  (bf16 MXU operands, f32 epilogue) -------
    x_bf = x_ref[...].reshape(rows, Cin)                        # bf16
    out1 = jnp.dot(x_bf, w1_ref[...], preferred_element_type=jnp.float32)
    out1 = jnp.maximum(out1 * s1_ref[...] + b1_ref[...], 0.0)   # f32

    # ---- conv2 (3x3, pad=1, stride=1) + bn2 + relu -------------------------
    # H/W-haloed scratch.  Only the halo ring is zeroed, every step (scratch is
    # per-core under megacore, so a program_id==0 guard would be unsafe); the
    # interior is fully overwritten below, so it is never re-zeroed.
    zrow = jnp.zeros((B, 1, W + 2, P), jnp.float32)
    pad_ref[:, 0:1, :, :] = zrow
    pad_ref[:, H + 1:H + 2, :, :] = zrow
    zcol = jnp.zeros((B, H, 1, P), jnp.float32)
    pad_ref[:, 1:H + 1, 0:1, :] = zcol
    pad_ref[:, 1:H + 1, W + 1:W + 2, :] = zcol
    pad_ref[:, 1:H + 1, 1:W + 1, :] = out1.reshape(B, H, W, P)

    # im2col: gather the 9 shifted taps and run ONE big-K matmul
    # (rows, 9P) @ (9P, P) instead of nine K=P matmuls.
    # NOTE: the dw in {0, 2} taps are sublane-offset reads; pltpu.roll on the
    # flattened rows could move that shift onto the XLU -- kept as static ref
    # slices here for lowering robustness.
    taps = []
    for dh in range(3):
        for dw in range(3):
            t = pad_ref[:, dh:dh + H, dw:dw + W, :]             # (B,H,W,P) f32
            taps.append(t.reshape(rows, P).astype(jnp.bfloat16))
    col = jnp.concatenate(taps, axis=-1)                        # (rows, 9P) bf16
    out2 = jnp.dot(col, w2_ref[...], preferred_element_type=jnp.float32)
    out2 = jnp.maximum(out2 * s2_ref[...] + b2_ref[...], 0.0)   # f32

    # ---- conv3 (1x1) + bn3 + residual + relu -------------------------------
    out3 = jnp.dot(out2.astype(jnp.bfloat16), w3_ref[...],
                   preferred_element_type=jnp.float32)
    out3 = out3 * s3_ref[...] + b3_ref[...]
    # Re-read the (still resident) input block for the residual instead of
    # keeping a live f32 copy of x across the three matmuls.
    resid = x_ref[...].reshape(rows, Cout).astype(jnp.float32)
    out3 = jnp.maximum(out3 + resid, 0.0)

    o_ref[...] = out3.reshape(B, HW, Cout).astype(o_ref.dtype)


def bottleneck_pallas(x_nhwc, params):
    """x_nhwc: (N, H, W, Cin) float32.  Returns (N, H, W, Cout) float32."""
    N, H, W, Cin = x_nhwc.shape
    P = params["w1"].shape[-1]               # planes
    Cout = params["w3"].shape[-1]            # planes * 4
    assert Cin == Cout, "downsample=None path requires inplanes == planes*4"

    Cin_p = _round_up(Cin, LANE)
    P_p = _round_up(P, LANE)
    Cout_p = _round_up(Cout, LANE)
    HW = H * W
    B_TILE = 2 if N % 2 == 0 else 1          # raise matmul M dim (B_TILE*H*W)

    # --- wrapper-side layout plumbing: flatten spatial, pad channels to 128
    #     lanes, cast MXU operands to bf16 (zero-padded channels stay zero).
    x_flat = jnp.pad(x_nhwc.reshape(N, HW, Cin),
                     ((0, 0), (0, 0), (0, Cin_p - Cin))).astype(jnp.bfloat16)
    w1 = jnp.pad(params["w1"],
                 ((0, Cin_p - Cin), (0, P_p - P))).astype(jnp.bfloat16)
    w2 = jnp.pad(params["w2"],                                  # (3,3,P,P) HWIO
                 ((0, 0), (0, 0), (0, P_p - P), (0, P_p - P)))
    w2 = w2.reshape(9 * P_p, P_p).astype(jnp.bfloat16)          # im2col layout
    w3 = jnp.pad(params["w3"],
                 ((0, P_p - P), (0, Cout_p - Cout))).astype(jnp.bfloat16)

    def pad_vec(v, c):                                          # BN scale/bias, f32
        return jnp.pad(v, ((0, 0), (0, c - v.shape[-1]))).astype(jnp.float32)

    s1, b1 = pad_vec(params["s1"], P_p), pad_vec(params["b1"], P_p)
    s2, b2 = pad_vec(params["s2"], P_p), pad_vec(params["b2"], P_p)
    s3, b3 = pad_vec(params["s3"], Cout_p), pad_vec(params["b3"], Cout_p)

    full = lambda shape: pl.BlockSpec(shape, lambda n: tuple(0 for _ in shape))
    kernel = functools.partial(_bottleneck_kernel, H=H, W=W)

    grid_spec = pltpu.PrefetchScalarGridSpec(
        num_scalar_prefetch=0,
        grid=(N // B_TILE,),
        in_specs=[
            pl.BlockSpec((B_TILE, HW, Cin_p), lambda n: (n, 0, 0)),    # x
            full((Cin_p, P_p)), full((1, P_p)), full((1, P_p)),        # conv1/bn1
            full((9 * P_p, P_p)), full((1, P_p)), full((1, P_p)),      # conv2/bn2
            full((P_p, Cout_p)), full((1, Cout_p)), full((1, Cout_p)), # conv3/bn3
        ],
        out_specs=pl.BlockSpec((B_TILE, HW, Cout_p), lambda n: (n, 0, 0)),
        scratch_shapes=[pltpu.VMEM((B_TILE, H + 2, W + 2, P_p), jnp.float32)],
    )

    out = pl.pallas_call(
        kernel,
        out_shape=jax.ShapeDtypeStruct((N, HW, Cout_p), jnp.float32),
        grid_spec=grid_spec,
        compiler_params=pltpu.CompilerParams(
            dimension_semantics=("parallel",),
            vmem_limit_bytes=48 * 1024 * 1024),
    )(x_flat, w1, s1, b1, w2, s2, b2, w3, s3, b3)

    return out[:, :, :Cout].reshape(N, H, W, Cout)


# ---------------------------------------------------------------------------
# Test harness
# ---------------------------------------------------------------------------
def fold_bn(gamma, beta, mean, var, eps=1e-5):
    scale = gamma / jnp.sqrt(var + eps)
    bias = beta - mean * scale
    return scale.reshape(1, -1), bias.reshape(1, -1)


def make_params(key, inplanes, planes):
    cout = planes * 4
    ks = jax.random.split(key, 15)
    # conv weights in matmul-ready layouts for the NHWC kernel
    w1 = jax.random.normal(ks[0], (inplanes, planes), jnp.float32) * 0.1       # 1x1
    w2 = jax.random.normal(ks[1], (3, 3, planes, planes), jnp.float32) * 0.1   # 3x3 HWIO
    w3 = jax.random.normal(ks[2], (planes, cout), jnp.float32) * 0.5           # 1x1
    # eval-mode BN with non-trivial running stats (distinct keys for each stat)
    bn = {}
    for i, c, k0 in ((1, planes, 3), (2, planes, 7), (3, cout, 11)):
        gamma = 1.0 + 0.1 * jax.random.normal(ks[k0], (c,), jnp.float32)
        beta = 0.1 * jax.random.normal(ks[k0 + 1], (c,), jnp.float32)
        mean = 0.1 * jax.random.normal(ks[k0 + 2], (c,), jnp.float32)
        var = jnp.abs(1.0 + 0.05 * jax.random.normal(ks[k0 + 3], (c,), jnp.float32))
        s, b = fold_bn(gamma, beta, mean, var)
        bn[f"s{i}"], bn[f"b{i}"] = s, b
    return dict(w1=w1, w2=w2, w3=w3, **bn)


def reference_jax(x_nhwc, p, *, bf16_ops=False):
    """Pure-JAX reference.  bf16_ops=True rounds operands/intermediates to bf16
    at the same points as the kernel (tight check); False is the exact f32
    module semantics (loose check)."""
    f32 = jnp.float32
    rnd = (lambda a: a.astype(jnp.bfloat16).astype(f32)) if bf16_ops else (lambda a: a)
    dn = jax.lax.conv_dimension_numbers(x_nhwc.shape, (1, 1, 1, 1),
                                        ("NHWC", "HWIO", "NHWC"))
    xr = rnd(x_nhwc)
    out = jax.lax.conv_general_dilated(
        xr, rnd(p["w1"]).reshape(1, 1, *p["w1"].shape), (1, 1), "VALID",
        dimension_numbers=dn)
    out = rnd(jnp.maximum(out * p["s1"][0] + p["b1"][0], 0.0))
    out = jax.lax.conv_general_dilated(
        out, rnd(p["w2"]), (1, 1), "SAME", dimension_numbers=dn)
    out = rnd(jnp.maximum(out * p["s2"][0] + p["b2"][0], 0.0))
    out = jax.lax.conv_general_dilated(
        out, rnd(p["w3"]).reshape(1, 1, *p["w3"].shape), (1, 1), "VALID",
        dimension_numbers=dn)
    out = out * p["s3"][0] + p["b3"][0]
    return jnp.maximum(out + xr, 0.0)


if __name__ == "__main__":
    N, H, W = 2, 8, 8
    planes = 4
    inplanes = planes * 4          # 16, so the residual adds cleanly (downsample=None)

    key = jax.random.PRNGKey(0)
    kx, kp = jax.random.split(key)
    x_nchw = jax.random.normal(kx, (N, inplanes, H, W), jnp.float32)  # PyTorch layout
    x_nhwc = jnp.transpose(x_nchw, (0, 2, 3, 1))

    params = make_params(kp, inplanes, planes)

    out = bottleneck_pallas(x_nhwc, params)
    out = jax.block_until_ready(out)

    # Tight check: reference with the same bf16 operand rounding as the kernel.
    ref_bf = reference_jax(x_nhwc, params, bf16_ops=True)
    # Loose check: exact f32 module semantics (bf16 MXU operands are a deliberate
    # accuracy/throughput trade, so the tolerance is bf16-scale).
    ref_f32 = reference_jax(x_nhwc, params)

    err_bf = float(jnp.max(jnp.abs(out - ref_bf)))
    err_f32 = float(jnp.max(jnp.abs(out - ref_f32)))
    assert jnp.allclose(out, ref_bf, atol=5e-3, rtol=5e-3), (err_bf, err_f32)
    assert jnp.allclose(out, ref_f32, atol=6e-2, rtol=6e-2), (err_bf, err_f32)

    print("KERNEL_OK")
</pallas_src>

<mosaic_0001>
module attributes {stable_mosaic.version = 11 : i64} {
  func.func @_bottleneck_kernel(%arg0: i32, %arg1: memref<2x64x128xbf16, #tpu.memory_space<vmem>>, %arg2: memref<128x128xbf16, #tpu.memory_space<vmem>>, %arg3: memref<1x128xf32, #tpu.memory_space<vmem>>, %arg4: memref<1x128xf32, #tpu.memory_space<vmem>>, %arg5: memref<1152x128xbf16, #tpu.memory_space<vmem>>, %arg6: memref<1x128xf32, #tpu.memory_space<vmem>>, %arg7: memref<1x128xf32, #tpu.memory_space<vmem>>, %arg8: memref<128x128xbf16, #tpu.memory_space<vmem>>, %arg9: memref<1x128xf32, #tpu.memory_space<vmem>>, %arg10: memref<1x128xf32, #tpu.memory_space<vmem>>, %arg11: memref<2x64x128xf32, #tpu.memory_space<vmem>>, %arg12: memref<2x10x10x128xf32, #tpu.memory_space<vmem>>) attributes {dimension_semantics = [#tpu.dimension_semantics<parallel>], iteration_bounds = array<i64: 1>, scalar_prefetch = 0 : i64, scratch_operands = 1 : i64, tpu.core_type = #tpu.core_type<tc>, window_params = [{transform_indices = @transform_0, window_bounds = array<i64: 2, 64, 128>}, {pipeline_mode = #tpu.pipeline_mode<synchronous>, transform_indices = @transform_1, window_bounds = array<i64: 128, 128>}, {pipeline_mode = #tpu.pipeline_mode<synchronous>, transform_indices = @transform_2, window_bounds = array<i64: 1, 128>}, {pipeline_mode = #tpu.pipeline_mode<synchronous>, transform_indices = @transform_3, window_bounds = array<i64: 1, 128>}, {pipeline_mode = #tpu.pipeline_mode<synchronous>, transform_indices = @transform_4, window_bounds = array<i64: 1152, 128>}, {pipeline_mode = #tpu.pipeline_mode<synchronous>, transform_indices = @transform_5, window_bounds = array<i64: 1, 128>}, {pipeline_mode = #tpu.pipeline_mode<synchronous>, transform_indices = @transform_6, window_bounds = array<i64: 1, 128>}, {pipeline_mode = #tpu.pipeline_mode<synchronous>, transform_indices = @transform_7, window_bounds = array<i64: 128, 128>}, {pipeline_mode = #tpu.pipeline_mode<synchronous>, transform_indices = @transform_8, window_bounds = array<i64: 1, 128>}, {pipeline_mode = #tpu.pipeline_mode<synchronous>, transform_indices = @transform_9, window_bounds = array<i64: 1, 128>}, {transform_indices = @transform_10, window_bounds = array<i64: 2, 64, 128>}]} {
    %c0 = arith.constant 0 : index
    %c0_0 = arith.constant 0 : index
    %c0_1 = arith.constant 0 : index
    %0 = vector.load %arg1[%c0, %c0_0, %c0_1] : memref<2x64x128xbf16, #tpu.memory_space<vmem>>, vector<2x64x128xbf16>
    %1 = vector.shape_cast %0 : vector<2x64x128xbf16> to vector<128x128xbf16>
    %c0_2 = arith.constant 0 : index
    %c0_3 = arith.constant 0 : index
    %2 = vector.load %arg2[%c0_2, %c0_3] : memref<128x128xbf16, #tpu.memory_space<vmem>>, vector<128x128xbf16>
    %cst = arith.constant dense<0.000000e+00> : vector<128x128xf32>
    %3 = tpu.matmul %1, %2, %cst {dimension_numbers = #tpu.dot_dimension_numbers<[1], [0], [0], [1], [0, 0, 1, 1], [], []>} : vector<128x128xbf16>, vector<128x128xbf16>, vector<128x128xf32> -> vector<128x128xf32>
    %c0_4 = arith.constant 0 : index
    %c0_5 = arith.constant 0 : index
    %4 = vector.load %arg3[%c0_4, %c0_5] : memref<1x128xf32, #tpu.memory_space<vmem>>, vector<1x128xf32>
    %5 = vector.broadcast %4 : vector<1x128xf32> to vector<128x128xf32>
    %6 = arith.mulf %3, %5 : vector<128x128xf32>
    %c0_6 = arith.constant 0 : index
    %c0_7 = arith.constant 0 : index
    %7 = vector.load %arg4[%c0_6, %c0_7] : memref<1x128xf32, #tpu.memory_space<vmem>>, vector<1x128xf32>
    %8 = vector.broadcast %7 : vector<1x128xf32> to vector<128x128xf32>
    %9 = arith.addf %6, %8 : vector<128x128xf32>
    %cst_8 = arith.constant 0.000000e+00 : f32
    %10 = vector.broadcast %cst_8 : f32 to vector<128x128xf32>
    %11 = arith.maximumf %9, %10 : vector<128x128xf32>
    %cst_9 = arith.constant 0.000000e+00 : f32
    %12 = vector.broadcast %cst_9 : f32 to vector<2x1x10x128xf32>
    %c0_10 = arith.constant 0 : index
    %c0_11 = arith.constant 0 : index
    %c0_12 = arith.constant 0 : index
    %c0_13 = arith.constant 0 : index
    %13 = vector.load %arg12[%c0_10, %c0_11, %c0_12, %c0_13] : memref<2x10x10x128xf32, #tpu.memory_space<vmem>>, vector<2x1x10x128xf32>
    tpu.vector_store %arg12[%c0_10, %c0_11, %c0_12, %c0_13], %12 {strides = array<i32>} : memref<2x10x10x128xf32, #tpu.memory_space<vmem>>, vector<2x1x10x128xf32>,
    %c0_14 = arith.constant 0 : index
    %c9 = arith.constant 9 : index
    %c0_15 = arith.constant 0 : index
    %c0_16 = arith.constant 0 : index
    %14 = vector.load %arg12[%c0_14, %c9, %c0_15, %c0_16] : memref<2x10x10x128xf32, #tpu.memory_space<vmem>>, vector<2x1x10x128xf32>
    tpu.vector_store %arg12[%c0_14, %c9, %c0_15, %c0_16], %12 {strides = array<i32>} : memref<2x10x10x128xf32, #tpu.memory_space<vmem>>, vector<2x1x10x128xf32>,
    %cst_17 = arith.constant 0.000000e+00 : f32
    %15 = vector.broadcast %cst_17 : f32 to vector<2x8x1x128xf32>
    %c0_18 = arith.constant 0 : index
    %c1 = arith.constant 1 : index
    %c0_19 = arith.constant 0 : index
    %c0_20 = arith.constant 0 : index
    %16 = vector.load %arg12[%c0_18, %c1, %c0_19, %c0_20] : memref<2x10x10x128xf32, #tpu.memory_space<vmem>>, vector<2x8x1x128xf32>
    tpu.vector_store %arg12[%c0_18, %c1, %c0_19, %c0_20], %15 {strides = array<i32>} : memref<2x10x10x128xf32, #tpu.memory_space<vmem>>, vector<2x8x1x128xf32>,
    %c0_21 = arith.constant 0 : index
    %c1_22 = arith.constant 1 : index
    %c9_23 = arith.constant 9 : index
    %c0_24 = arith.constant 0 : index
    %17 = vector.load %arg12[%c0_21, %c1_22, %c9_23, %c0_24] : memref<2x10x10x128xf32, #tpu.memory_space<vmem>>, vector<2x8x1x128xf32>
    tpu.vector_store %arg12[%c0_21, %c1_22, %c9_23, %c0_24], %15 {strides = array<i32>} : memref<2x10x10x128xf32, #tpu.memory_space<vmem>>, vector<2x8x1x128xf32>,
    %18 = vector.shape_cast %11 : vector<128x128xf32> to vector<2x8x8x128xf32>
    %c0_25 = arith.constant 0 : index
    %c1_26 = arith.constant 1 : index
    %c1_27 = arith.constant 1 : index
    %c0_28 = arith.constant 0 : index
    %19 = vector.load %arg12[%c0_25, %c1_26, %c1_27, %c0_28] : memref<2x10x10x128xf32, #tpu.memory_space<vmem>>, vector<2x8x8x128xf32>
    tpu.vector_store %arg12[%c0_25, %c1_26, %c1_27, %c0_28], %18 {strides = array<i32>} : memref<2x10x10x128xf32, #tpu.memory_space<vmem>>, vector<2x8x8x128xf32>,
    %c0_29 = arith.constant 0 : index
    %c0_30 = arith.constant 0 : index
    %c0_31 = arith.constant 0 : index
    %c0_32 = arith.constant 0 : index
    %20 = vector.load %arg12[%c0_29, %c0_30, %c0_31, %c0_32] : memref<2x10x10x128xf32, #tpu.memory_space<vmem>>, vector<2x8x8x128xf32>
    %21 = vector.shape_cast %20 : vector<2x8x8x128xf32> to vector<128x128xf32>
    %22 = arith.truncf %21 : vector<128x128xf32> to vector<128x128xbf16>
    %c0_33 = arith.constant 0 : index
    %c0_34 = arith.constant 0 : index
    %c1_35 = arith.constant 1 : index
    %c0_36 = arith.constant 0 : index
    %23 = vector.load %arg12[%c0_33, %c0_34, %c1_35, %c0_36] : memref<2x10x10x128xf32, #tpu.memory_space<vmem>>, vector<2x8x8x128xf32>
    %24 = vector.shape_cast %23 : vector<2x8x8x128xf32> to vector<128x128xf32>
    %25 = arith.truncf %24 : vector<128x128xf32> to vector<128x128xbf16>
    %c0_37 = arith.constant 0 : index
    %c0_38 = arith.constant 0 : index
    %c2 = arith.constant 2 : index
    %c0_39 = arith.constant 0 : index
    %26 = vector.load %arg12[%c0_37, %c0_38, %c2, %c0_39] : memref<2x10x10x128xf32, #tpu.memory_space<vmem>>, vector<2x8x8x128xf32>
    %27 = vector.shape_cast %26 : vector<2x8x8x128xf32> to vector<128x128xf32>
    %28 = arith.truncf %27 : vector<128x128xf32> to vector<128x128xbf16>
    %c0_40 = arith.constant 0 : index
    %c1_41 = arith.constant 1 : index
    %c0_42 = arith.constant 0 : index
    %c0_43 = arith.constant 0 : index
    %29 = vector.load %arg12[%c0_40, %c1_41, %c0_42, %c0_43] : memref<2x10x10x128xf32, #tpu.memory_space<vmem>>, vector<2x8x8x128xf32>
    %30 = vector.shape_cast %29 : vector<2x8x8x128xf32> to vector<128x128xf32>
    %31 = arith.truncf %30 : vector<128x128xf32> to vector<128x128xbf16>
    %c0_44 = arith.constant 0 : index
    %c1_45 = arith.constant 1 : index
    %c1_46 = arith.constant 1 : index
    %c0_47 = arith.constant 0 : index
    %32 = vector.load %arg12[%c0_44, %c1_45, %c1_46, %c0_47] : memref<2x10x10x128xf32, #tpu.memory_space<vmem>>, vector<2x8x8x128xf32>
    %33 = vector.shape_cast %32 : vector<2x8x8x128xf32> to vector<128x128xf32>
    %34 = arith.truncf %33 : vector<128x128xf32> to vector<128x128xbf16>
    %c0_48 = arith.constant 0 : index
    %c1_49 = arith.constant 1 : index
    %c2_50 = arith.constant 2 : index
    %c0_51 = arith.constant 0 : index
    %35 = vector.load %arg12[%c0_48, %c1_49, %c2_50, %c0_51] : memref<2x10x10x128xf32, #tpu.memory_space<vmem>>, vector<2x8x8x128xf32>
    %36 = vector.shape_cast %35 : vector<2x8x8x128xf32> to vector<128x128xf32>
    %37 = arith.truncf %36 : vector<128x128xf32> to vector<128x128xbf16>
    %c0_52 = arith.constant 0 : index
    %c2_53 = arith.constant 2 : index
    %c0_54 = arith.constant 0 : index
    %c0_55 = arith.constant 0 : index
    %38 = vector.load %arg12[%c0_52, %c2_53, %c0_54, %c0_55] : memref<2x10x10x128xf32, #tpu.memory_space<vmem>>, vector<2x8x8x128xf32>
    %39 = vector.shape_cast %38 : vector<2x8x8x128xf32> to vector<128x128xf32>
    %40 = arith.truncf %39 : vector<128x128xf32> to vector<128x128xbf16>
    %c0_56 = arith.constant 0 : index
    %c2_57 = arith.constant 2 : index
    %c1_58 = arith.constant 1 : index
    %c0_59 = arith.constant 0 : index
    %41 = vector.load %arg12[%c0_56, %c2_57, %c1_58, %c0_59] : memref<2x10x10x128xf32, #tpu.memory_space<vmem>>, vector<2x8x8x128xf32>
    %42 = vector.shape_cast %41 : vector<2x8x8x128xf32> to vector<128x128xf32>
    %43 = arith.truncf %42 : vector<128x128xf32> to vector<128x128xbf16>
    %c0_60 = arith.constant 0 : index
    %c2_61 = arith.constant 2 : index
    %c2_62 = arith.constant 2 : index
    %c0_63 = arith.constant 0 : index
    %44 = vector.load %arg12[%c0_60, %c2_61, %c2_62, %c0_63] : memref<2x10x10x128xf32, #tpu.memory_space<vmem>>, vector<2x8x8x128xf32>
    %45 = vector.shape_cast %44 : vector<2x8x8x128xf32> to vector<128x128xf32>
    %46 = arith.truncf %45 : vector<128x128xf32> to vector<128x128xbf16>
    %47 = tpu.concatenate %22, %25, %28, %31, %34, %37, %40, %43, %46 in 1 : vector<128x128xbf16>, vector<128x128xbf16>, vector<128x128xbf16>, vector<128x128xbf16>, vector<128x128xbf16>, vector<128x128xbf16>, vector<128x128xbf16>, vector<128x128xbf16>, vector<128x128xbf16> -> vector<128x1152xbf16>
    %c0_64 = arith.constant 0 : index
    %c0_65 = arith.constant 0 : index
    %48 = vector.load %arg5[%c0_64, %c0_65] : memref<1152x128xbf16, #tpu.memory_space<vmem>>, vector<1152x128xbf16>
    %cst_66 = arith.constant dense<0.000000e+00> : vector<128x128xf32>
    %49 = tpu.matmul %47, %48, %cst_66 {dimension_numbers = #tpu.dot_dimension_numbers<[1], [0], [0], [1], [0, 0, 1, 1], [], []>} : vector<128x1152xbf16>, vector<1152x128xbf16>, vector<128x128xf32> -> vector<128x128xf32>
    %c0_67 = arith.constant 0 : index
    %c0_68 = arith.constant 0 : index
    %50 = vector.load %arg6[%c0_67, %c0_68] : memref<1x128xf32, #tpu.memory_space<vmem>>, vector<1x128xf32>
    %51 = vector.broadcast %50 : vector<1x128xf32> to vector<128x128xf32>
    %52 = arith.mulf %49, %51 : vector<128x128xf32>
    %c0_69 = arith.constant 0 : index
    %c0_70 = arith.constant 0 : index
    %53 = vector.load %arg7[%c0_69, %c0_70] : memref<1x128xf32, #tpu.memory_space<vmem>>, vector<1x128xf32>
    %54 = vector.broadcast %53 : vector<1x128xf32> to vector<128x128xf32>
    %55 = arith.addf %52, %54 : vector<128x128xf32>
    %cst_71 = arith.constant 0.000000e+00 : f32
    %56 = vector.broadcast %cst_71 : f32 to vector<128x128xf32>
    %57 = arith.maximumf %55, %56 : vector<128x128xf32>
    %58 = arith.truncf %57 : vector<128x128xf32> to vector<128x128xbf16>
    %c0_72 = arith.constant 0 : index
    %c0_73 = arith.constant 0 : index
    %59 = vector.load %arg8[%c0_72, %c0_73] : memref<128x128xbf16, #tpu.memory_space<vmem>>, vector<128x128xbf16>
    %cst_74 = arith.constant dense<0.000000e+00> : vector<128x128xf32>
    %60 = tpu.matmul %58, %59, %cst_74 {dimension_numbers = #tpu.dot_dimension_numbers<[1], [0], [0], [1], [0, 0, 1, 1], [], []>} : vector<128x128xbf16>, vector<128x128xbf16>, vector<128x128xf32> -> vector<128x128xf32>
    %c0_75 = arith.constant 0 : index
    %c0_76 = arith.constant 0 : index
    %61 = vector.load %arg9[%c0_75, %c0_76] : memref<1x128xf32, #tpu.memory_space<vmem>>, vector<1x128xf32>
    %62 = vector.broadcast %61 : vector<1x128xf32> to vector<128x128xf32>
    %63 = arith.mulf %60, %62 : vector<128x128xf32>
    %c0_77 = arith.constant 0 : index
    %c0_78 = arith.constant 0 : index
    %64 = vector.load %arg10[%c0_77, %c0_78] : memref<1x128xf32, #tpu.memory_space<vmem>>, vector<1x128xf32>
    %65 = vector.broadcast %64 : vector<1x128xf32> to vector<128x128xf32>
    %66 = arith.addf %63, %65 : vector<128x128xf32>
    %c0_79 = arith.constant 0 : index
    %c0_80 = arith.constant 0 : index
    %c0_81 = arith.constant 0 : index
    %67 = vector.load %arg1[%c0_79, %c0_80, %c0_81] : memref<2x64x128xbf16, #tpu.memory_space<vmem>>, vector<2x64x128xbf16>
    %68 = vector.shape_cast %67 : vector<2x64x128xbf16> to vector<128x128xbf16>
    %69 = arith.extf %68 : vector<128x128xbf16> to vector<128x128xf32>
    %70 = arith.addf %66, %69 : vector<128x128xf32>
    %cst_82 = arith.constant 0.000000e+00 : f32
    %71 = vector.broadcast %cst_82 : f32 to vector<128x128xf32>
    %72 = arith.maximumf %70, %71 : vector<128x128xf32>
    %73 = vector.shape_cast %72 : vector<128x128xf32> to vector<2x64x128xf32>
    %c0_83 = arith.constant 0 : index
    %c0_84 = arith.constant 0 : index
    %c0_85 = arith.constant 0 : index
    %74 = vector.load %arg11[%c0_83, %c0_84, %c0_85] : memref<2x64x128xf32, #tpu.memory_space<vmem>>, vector<2x64x128xf32>
    tpu.vector_store %arg11[%c0_83, %c0_84, %c0_85], %73 {strides = array<i32>} : memref<2x64x128xf32, #tpu.memory_space<vmem>>, vector<2x64x128xf32>,
    return
  }
  func.func @transform_0(%arg0: i32) -> (i32, i32, i32) {
    %c0_i32 = arith.constant 0 : i32
    %c0_i32_0 = arith.constant 0 : i32
    %c0_i32_1 = arith.constant 0 : i32
    return %arg0, %c0_i32, %c0_i32_0 : i32, i32, i32
  }
  func.func @transform_1(%arg0: i32) -> (i32, i32) {
    %c0_i32 = arith.constant 0 : i32
    %c0_i32_0 = arith.constant 0 : i32
    %c0_i32_1 = arith.constant 0 : i32
    return %c0_i32, %c0_i32_0 : i32, i32
  }
  func.func @transform_2(%arg0: i32) -> (i32, i32) {
    %c0_i32 = arith.constant 0 : i32
    %c0_i32_0 = arith.constant 0 : i32
    %c0_i32_1 = arith.constant 0 : i32
    return %c0_i32, %c0_i32_0 : i32, i32
  }
  func.func @transform_3(%arg0: i32) -> (i32, i32) {
    %c0_i32 = arith.constant 0 : i32
    %c0_i32_0 = arith.constant 0 : i32
    %c0_i32_1 = arith.constant 0 : i32
    return %c0_i32, %c0_i32_0 : i32, i32
  }
  func.func @transform_4(%arg0: i32) -> (i32, i32) {
    %c0_i32 = arith.constant 0 : i32
    %c0_i32_0 = arith.constant 0 : i32
    %c0_i32_1 = arith.constant 0 : i32
    return %c0_i32, %c0_i32_0 : i32, i32
  }
  func.func @transform_5(%arg0: i32) -> (i32, i32) {
    %c0_i32 = arith.constant 0 : i32
    %c0_i32_0 = arith.constant 0 : i32
    %c0_i32_1 = arith.constant 0 : i32
    return %c0_i32, %c0_i32_0 : i32, i32
  }
  func.func @transform_6(%arg0: i32) -> (i32, i32) {
    %c0_i32 = arith.constant 0 : i32
    %c0_i32_0 = arith.constant 0 : i32
    %c0_i32_1 = arith.constant 0 : i32
    return %c0_i32, %c0_i32_0 : i32, i32
  }
  func.func @transform_7(%arg0: i32) -> (i32, i32) {
    %c0_i32 = arith.constant 0 : i32
    %c0_i32_0 = arith.constant 0 : i32
    %c0_i32_1 = arith.constant 0 : i32
    return %c0_i32, %c0_i32_0 : i32, i32
  }
  func.func @transform_8(%arg0: i32) -> (i32, i32) {
    %c0_i32 = arith.constant 0 : i32
    %c0_i32_0 = arith.constant 0 : i32
    %c0_i32_1 = arith.constant 0 : i32
    return %c0_i32, %c0_i32_0 : i32, i32
  }
  func.func @transform_9(%arg0: i32) -> (i32, i32) {
    %c0_i32 = arith.constant 0 : i32
    %c0_i32_0 = arith.constant 0 : i32
    %c0_i32_1 = arith.constant 0 : i32
    return %c0_i32, %c0_i32_0 : i32, i32
  }
  func.func @transform_10(%arg0: i32) -> (i32, i32, i32) {
    %c0_i32 = arith.constant 0 : i32
    %c0_i32_0 = arith.constant 0 : i32
    %c0_i32_1 = arith.constant 0 : i32
    return %arg0, %c0_i32, %c0_i32_0 : i32, i32, i32
  }
}

</mosaic_0001>

<bundles_post_ra>
// kernel: tpu_custom_call.1
= control target key start
LH: loop header
LB: loop body
LE: loop exit
PB: predicated region body
PF: predicated region fallthrough
CT: control target
= control target key end

     0   :  { %15 = vsyncpa [#allocation4], 0  ;;  %s3533_s0 = inlined_call_operand.hbm [shape: bf16[2,64,128], index: 0, kind: input, shape index: {}]   ;;  %s3534_s1 = inlined_call_operand.hbm [shape: bf16[128,128], index: 1, kind: input, shape index: {}]   ;;  %s3535_s2 = inlined_call_operand.vmem [shape: f32[1,128], index: 2, kind: input, shape index: {}]   ;;  %s3536_s3 = inlined_call_operand.vmem [shape: f32[1,128], index: 3, kind: input, shape index: {}]   ;;  %s3537_s4 = inlined_call_operand.hbm [shape: bf16[1152,128], index: 4, kind: input, shape index: {}]   ;;  %s3538_s5 = inlined_call_operand.vmem [shape: f32[1,128], index: 5, kind: input, shape index: {}]   ;;  %s3539_s6 = inlined_call_operand.vmem [shape: f32[1,128], index: 6, kind: input, shape index: {}]   ;;  %s3540_s7 = inlined_call_operand.hbm [shape: bf16[128,128], index: 7, kind: input, shape index: {}]   ;;  %s3541_s8 = inlined_call_operand.vmem [shape: f32[1,128], index: 8, kind: input, shape index: {}]   ;;  %s3542_s9 = inlined_call_operand.vmem [shape: f32[1,128], index: 9, kind: input, shape index: {}]   ;;  %s3543_s10 = inlined_call_operand.hbm [shape: f32[2,64,128], index: 10, kind: output, shape index: {}]  }
   0x1   :  { %16 = vsyncpa [#allocation7], 0 }
   0x2   :  { %17 = vsyncpa [#allocation10], 0 }
   0x3   :  { %18 = vsyncpa [#allocation5], 0  ;;  %s2862_s13 = smov [#allocation6]   ;;  %s2863_s15 = smov [#allocation3]  }
   0x4   :  { %s36_s14 = sshll.u32 %s2862_s13, 4  ;;  %s24_s16 = sshll.u32 %s2863_s15, 4  ;;  %s37_s14 = int_to_ptr.vmem [resolvable:$true] %s36_s14  ;;  %s25_s16 = int_to_ptr.vmem [resolvable:$true] %s24_s16 }
   0x5   :  { %s2762_s17 = scalar_lea.vmem %s37_s14, 1024  ;;  %p2767_p1 = scmp.lt.s32.totalorder %s37_s14, %s37_s14 }
   0x6   :  { %p2763_p0 = scmp.ne.s32.totalorder %s37_s14, %s2762_s17  ;;  %p2768_p2 = scmp.lt.s32.totalorder %s2762_s17, %s2762_s17 }
   0x8   :  { %p2769_p3 = por %p2768_p2, %p2767_p1 }
   0xa   :  { %p2770_p4 = pnand %p2769_p3, %p2763_p0 }
   0xc   :  { %2773 = shalt.err (!%p2770_p4)
}
   0xd   :  { %s2864_s18 = smov 64   ;;  %s2865_s19 = smov 4  }
   0xe   :  { %42 = dma.hbm_to_vmem [thread:$0]  %s3534_s1, 1024, %s37_s14, [#allocation7], %s2864_s18, %s2864_s18, %s2865_s19  }
   0xf   :  { %s2782_s22 = scalar_lea.vmem %s25_s16, 1024  ;;  %p2787_p6 = scmp.lt.s32.totalorder %s25_s16, %s25_s16 }
  0x10   :  { %p2783_p5 = scmp.ne.s32.totalorder %s25_s16, %s2782_s22  ;;  %p2788_p7 = scmp.lt.s32.totalorder %s2782_s22, %s2782_s22 }
  0x12   :  { %p2789_p8 = por %p2788_p7, %p2787_p6 }
  0x14   :  { %p2790_p9 = pnand %p2789_p8, %p2783_p5 }
  0x16   :  { %2793 = shalt.err (!%p2790_p9)
}
  0x17   :  { %30 = dma.hbm_to_vmem [thread:$0]  %s3533_s0, 1024, %s25_s16, [#allocation4], %s2864_s18, %s2864_s18, %s2865_s19  }
  0x18   :  { %s2866_s25 = smov [#allocation8]   ;;  %s2867_s27 = smov [#allocation9]  }
  0x19   :  { %s52_s26 = sshll.u32 %s2866_s25, 4  ;;  %s68_s28 = sshll.u32 %s2867_s27, 4  ;;  %s53_s26 = int_to_ptr.vmem [resolvable:$true] %s52_s26  ;;  %s69_s28 = int_to_ptr.vmem [resolvable:$true] %s68_s28 }
  0x1a   :  { %s2802_s1 = scalar_lea.vmem %s53_s26, 9216  ;;  %p2807_p11 = scmp.lt.s32.totalorder %s53_s26, %s53_s26 }
  0x1b   :  { %p2803_p10 = scmp.ne.s32.totalorder %s53_s26, %s2802_s1  ;;  %p2808_p12 = scmp.lt.s32.totalorder %s2802_s1, %s2802_s1 }
  0x1d   :  { %p2809_p13 = por %p2808_p12, %p2807_p11 }
  0x1f   :  { %p2810_p0 = pnand %p2809_p13, %p2803_p10 }
  0x21   :  { %2813 = shalt.err (!%p2810_p0)
}
  0x22   :  { %58 = dma.hbm_to_vmem [thread:$0]  %s3537_s4, 9216, %s53_s26, [#allocation7], %s2864_s18, %s2864_s18, %s2865_s19  }
  0x23   :  { %s2822_s0 = scalar_lea.vmem %s69_s28, 1024  ;;  %p2827_p2 = scmp.lt.s32.totalorder %s69_s28, %s69_s28 }
  0x24   :  { %p2823_p1 = scmp.ne.s32.totalorder %s69_s28, %s2822_s0  ;;  %p2828_p3 = scmp.lt.s32.totalorder %s2822_s0, %s2822_s0 }
  0x26   :  { %p2829_p4 = por %p2828_p3, %p2827_p2 }
  0x28   :  { %p2830_p5 = pnand %p2829_p4, %p2823_p1 }
  0x2a   :  { %2833 = shalt.err (!%p2830_p5)
}
  0x2b   :  { %74 = dma.hbm_to_vmem [thread:$0]  %s3540_s7, 1024, %s69_s28, [#allocation10], %s2864_s18, %s2864_s18, %s2865_s19  }
  0x2c   :  { %2854 = dma.done.wait [#allocation4], 1024  }
  0x2d   :  { %2855 = vsyncadd [#allocation4], 4294966272 }
  0x2e   :  { %2856 = dma.done.wait [#allocation7], 10240  }
  0x2f   :  { %2857 = vsyncadd [#allocation7], 4294957056 }
  0x30   :  { %2858 = dma.done.wait [#allocation10], 1024  }
  0x31   :  { %2859 = vsyncadd [#allocation10], 4294966272  ;;  %v2658_v0 = vld [vmem:[#allocation6 + $0x38] sm:$0xff]   ;;  %v2659_v1 = vld [vmem:[#allocation6 + $0x30] sm:$0xff]   ;;  %v2868_v31 = vmov 0.0  }
  0x32   :  { %2536 = vmatprep.subr.bf16.mxu0 %v2658_v0  ;;  %v2660_v2 = vld [vmem:[#allocation6 + $0x28] sm:$0xff]   ;;  %v2661_v3 = vld [vmem:[#allocation6 + $0x20] sm:$0xff]   ;;  %v2662_v5 = vld [vmem:[#allocation6 + $0x18] sm:$0xff]   ;;  %379 = vst [vmem:[#allocation2] sm:$0xff] %v2868_v31 }
  0x33   :  { %2537 = vmatpush3.bf16.msra.mxu0 %v2658_v0  ;;  %v2666_v4 = vld [vmem:[#allocation3] sm:$0xff]   ;;  %v2663_v6 = vld [vmem:[#allocation6 + $0x10] sm:$0xff]   ;;  %v2674_v7 = vld [vmem:[#allocation8 + $0x78] sm:$0xff]   ;;  %380 = vst [vmem:[#allocation2 + $0x8] sm:$0x3] %v2868_v31 }
  0x34   :  { %2538 = vmatprep.subr.bf16.mxu0 %v2659_v1  ;;  %2552 = vmatprep.mubr.bf16.mxu0 %v2666_v4  ;;  %v2675_v8 = vld [vmem:[#allocation8 + $0x38] sm:$0xff]   ;;  %v2676_v9 = vld [vmem:[#allocation8 + $0x70] sm:$0xff]   ;;  %v2664_v11 = vld [vmem:[#allocation6 + $0x8] sm:$0xff]   ;;  %381 = vst [vmem:[#allocation2 + $0xa0] sm:$0xff] %v2868_v31 }
  0x35   :  { %2248 = vmatprep.subr.bf16.mxu1 %v2674_v7  ;;  %v2677_v10 = vld [vmem:[#allocation8 + $0x30] sm:$0xff]   ;;  %v2680_v12 = vld [vmem:[#allocation8 + $0x68] sm:$0xff]   ;;  %v2665_v14 = vld [vmem:[#allocation6] sm:$0xff]   ;;  %382 = vst [vmem:[#allocation2 + $0xa8] sm:$0x3] %v2868_v31 }
  0x36   :  { %2249 = vmatpush3.bf16.msra.mxu1 %v2675_v8  ;;  %v2681_v13 = vld [vmem:[#allocation8 + $0x28] sm:$0xff]   ;;  %v2678_v15 = vld [vmem:[#allocation8 + $0xf8] sm:$0xff]   ;;  %v2684_v16 = vld [vmem:[#allocation8 + $0x60] sm:$0xff]   ;;  %384 = vst [vmem:[#allocation2 + $0x90] sm:$0xff] %v2868_v31 }
  0x37   :  { %2539 = vmatpush3.bf16.msra.mxu0 %v2659_v1  ;;  %2250 = vmatprep.subr.bf16.mxu1 %v2676_v9  ;;  %v2667_v17 = vld [vmem:[#allocation3 + $0x8] sm:$0xff]   ;;  %v2668_v18 = vld [vmem:[#allocation3 + $0x10] sm:$0xff]   ;;  %v2679_v19 = vld [vmem:[#allocation8 + $0xb8] sm:$0xff]   ;;  %385 = vst [vmem:[#allocation2 + $0x98] sm:$0x3] %v2868_v31 }
  0x38   :  { %2540 = vmatprep.subr.bf16.mxu0 %v2660_v2  ;;  %v2682_v20 = vld [vmem:[#allocation8 + $0xf0] sm:$0xff]   ;;  %v2669_v22 = vld [vmem:[#allocation3 + $0x18] sm:$0xff]   ;;  %v2670_v23 = vld [vmem:[#allocation3 + $0x20] sm:$0xff]   ;;  %386 = vst [vmem:[#allocation2 + $0x130] sm:$0xff] %v2868_v31 }
  0x39   :  { %v2683_v21 = vld [vmem:[#allocation8 + $0xb0] sm:$0xff]   ;;  %v2671_v24 = vld [vmem:[#allocation3 + $0x28] sm:$0xff]   ;;  %v2673_v26 = vld [vmem:[#allocation3 + $0x38] sm:$0xff]   ;;  %387 = vst [vmem:[#allocation2 + $0x138] sm:$0x3] %v2868_v31 }
  0x3a   :  { %2251 = vmatpush3.bf16.msra.mxu1 %v2677_v10  ;;  %v2672_v25 = vld [vmem:[#allocation3 + $0x30] sm:$0xff]   ;;  %v2685_v27 = vld [vmem:[#allocation8 + $0x20] sm:$0xff]   ;;  %v2686_v28 = vld [vmem:[#allocation8 + $0xe8] sm:$0xff]   ;;  %389 = vst [vmem:[#allocation2 + $0x10] sm:$0x1] %v2868_v31 }
  0x3b   :  { %2541 = vmatpush3.bf16.msra.mxu0 %v2660_v2  ;;  %2252 = vmatprep.subr.bf16.mxu1 %v2680_v12  ;;  %v2687_v29 = vld [vmem:[#allocation8 + $0xa8] sm:$0xff]   ;;  %v2688_v30 = vld [vmem:[#allocation8 + $0x58] sm:$0xff]   ;;  %390 = vst [vmem:[#allocation2 + $0x20] sm:$0x1] %v2868_v31  ;;  %391 = vst [vmem:[#allocation2 + $0x30] sm:$0x1] %v2868_v31 }
  0x3c   :  { %2542 = vmatprep.subr.bf16.mxu0 %v2661_v3  ;;  %392 = vst [vmem:[#allocation2 + $0x40] sm:$0x1] %v2868_v31  ;;  %393 = vst [vmem:[#allocation2 + $0x50] sm:$0x1] %v2868_v31  ;;  %v2689_v32 = vld [vmem:[#allocation8 + $0x18] sm:$0xff]   ;;  %v2690_v33 = vld [vmem:[#allocation8 + $0xe0] sm:$0xff]  }
  0x3d   :  { %394 = vst [vmem:[#allocation2 + $0x60] sm:$0x1] %v2868_v31  ;;  %395 = vst [vmem:[#allocation2 + $0x70] sm:$0x1] %v2868_v31  ;;  %v2691_v34 = vld [vmem:[#allocation8 + $0xa0] sm:$0xff]   ;;  %v2692_v35 = vld [vmem:[#allocation8 + $0x50] sm:$0xff]  }
  0x3e   :  { %2253 = vmatpush3.bf16.msra.mxu1 %v2681_v13  ;;  %396 = vst [vmem:[#allocation2 + $0x80] sm:$0x1] %v2868_v31  ;;  %397 = vst [vmem:[#allocation2 + $0xb0] sm:$0x1] %v2868_v31  ;;  %v2693_v36 = vld [vmem:[#allocation8 + $0x10] sm:$0xff]   ;;  %v2694_v37 = vld [vmem:[#allocation8 + $0xd8] sm:$0xff]  }
  0x3f   :  { %2543 = vmatpush3.bf16.msra.mxu0 %v2661_v3  ;;  %2254 = vmatprep.subr.bf16.mxu1 %v2684_v16  ;;  %398 = vst [vmem:[#allocation2 + $0xc0] sm:$0x1] %v2868_v31  ;;  %399 = vst [vmem:[#allocation2 + $0xd0] sm:$0x1] %v2868_v31  ;;  %v2695_v38 = vld [vmem:[#allocation8 + $0x98] sm:$0xff]   ;;  %v2696_v39 = vld [vmem:[#allocation8 + $0x48] sm:$0xff]  }
  0x40   :  { %2544 = vmatprep.subr.bf16.mxu0 %v2662_v5  ;;  %400 = vst [vmem:[#allocation2 + $0xe0] sm:$0x1] %v2868_v31  ;;  %401 = vst [vmem:[#allocation2 + $0xf0] sm:$0x1] %v2868_v31  ;;  %v2697_v40 = vld [vmem:[#allocation8 + $0x8] sm:$0xff]   ;;  %v2698_v41 = vld [vmem:[#allocation8 + $0xd0] sm:$0xff]  }
  0x41   :  { %402 = vst [vmem:[#allocation2 + $0x100] sm:$0x1] %v2868_v31  ;;  %403 = vst [vmem:[#allocation2 + $0x110] sm:$0x1] %v2868_v31  ;;  %v2699_v42 = vld [vmem:[#allocation8 + $0x90] sm:$0xff]   ;;  %v2700_v43 = vld [vmem:[#allocation8 + $0x40] sm:$0xff]  }
  0x42   :  { %2255 = vmatpush3.bf16.msra.mxu1 %v2685_v27  ;;  %404 = vst [vmem:[#allocation2 + $0x120] sm:$0x1] %v2868_v31  ;;  %405 = vst [vmem:[#allocation2 + $0x19] sm:$0x1] %v2868_v31  ;;  %v2701_v44 = vld [vmem:[#allocation8] sm:$0xff]   ;;  %v2702_v45 = vld [vmem:[#allocation8 + $0xc8] sm:$0xff]  }
  0x43   :  { %2545 = vmatpush3.bf16.msra.mxu0 %v2662_v5  ;;  %406 = vst [vmem:[#allocation2 + $0x29] sm:$0x1] %v2868_v31  ;;  %407 = vst [vmem:[#allocation2 + $0x39] sm:$0x1] %v2868_v31  ;;  %2256 = vmatprep.subr.bf16.mxu1 %v2688_v30  ;;  %v2703_v46 = vld [vmem:[#allocation8 + $0x88] sm:$0xff]   ;;  %v2705_v47 = vld [vmem:[#allocation8 + $0xc0] sm:$0xff]  }
  0x44   :  { %2546 = vmatprep.subr.bf16.mxu0 %v2663_v6  ;;  %408 = vst [vmem:[#allocation2 + $0x49] sm:$0x1] %v2868_v31  ;;  %409 = vst [vmem:[#allocation2 + $0x59] sm:$0x1] %v2868_v31  ;;  %v2707_v48 = vld [vmem:[#allocation8 + $0x80] sm:$0xff]   ;;  %v2704_v49 = vld [vmem:[#allocation8 + $0x178] sm:$0xff]  }
  0x45   :  { %410 = vst [vmem:[#allocation2 + $0x69] sm:$0x1] %v2868_v31  ;;  %411 = vst [vmem:[#allocation2 + $0x79] sm:$0x1] %v2868_v31  ;;  %v2714_v50 = vld [vmem:[#allocation8 + $0x1f8] sm:$0xff]   ;;  %v461_v63 = vld [vmem:[#allocation2 + $0x1] sm:$0xff] }
  0x46   :  { %412 = vst [vmem:[#allocation2 + $0x89] sm:$0x1] %v2868_v31  ;;  %413 = vst [vmem:[#allocation2 + $0xb9] sm:$0x1] %v2868_v31  ;;  %2257 = vmatpush3.bf16.msra.mxu1 %v2689_v32  ;;  %v2994_v51 = vld [vmem:[%s3535_s2] ss:$0 sm:$0xff] }
  0x47   :  { %2547 = vmatpush3.bf16.msra.mxu0 %v2663_v6  ;;  %414 = vst [vmem:[#allocation2 + $0xc9] sm:$0x1] %v2868_v31  ;;  %415 = vst [vmem:[#allocation2 + $0xd9] sm:$0x1] %v2868_v31  ;;  %2258 = vmatprep.subr.bf16.mxu1 %v2692_v35  ;;  %v2999_v53 = vld [vmem:[%s3536_s3] ss:$0 sm:$0xff] }
  0x48   :  { %2548 = vmatprep.subr.bf16.mxu0 %v2664_v11  ;;  %416 = vst [vmem:[#allocation2 + $0xe9] sm:$0x1] %v2868_v31  ;;  %417 = vst [vmem:[#allocation2 + $0xf9] sm:$0x1] %v2868_v31 }
  0x49   :  { %418 = vst [vmem:[#allocation2 + $0x109] sm:$0x1] %v2868_v31  ;;  %419 = vst [vmem:[#allocation2 + $0x119] sm:$0x1] %v2868_v31 }
  0x4a   :  { %420 = vst [vmem:[#allocation2 + $0x129] sm:$0x1] %v2868_v31  ;;  %2259 = vmatpush3.bf16.msra.mxu1 %v2693_v36  ;;  %v485_v36 = vld [vmem:[#allocation2 + $0x2] sm:$0xff] }
  0x4b   :  { %2549 = vmatpush3.bf16.msra.mxu0 %v2664_v11  ;;  %2260 = vmatprep.subr.bf16.mxu1 %v2696_v39 }
  0x4c   :  { %2550 = vmatprep.subr.bf16.mxu0 %v2665_v14 }
  0x4e   :  { %2261 = vmatpush3.bf16.msra.mxu1 %v2697_v40 }
  0x4f   :  { %2551 = vmatpush3.bf16.msra.mxu0 %v2665_v14  ;;  %2262 = vmatprep.subr.bf16.mxu1 %v2700_v43 }
  0x50   :  { %2312 = vmatprep.subr.bf16.mxu0 %v2678_v15 }
  0x52   :  { %2553 = vmatmul.mubr.bf16.vlgmr.msra.gmra.mxu0 %v2667_v17  ;;  %2263 = vmatpush3.bf16.msra.mxu1 %v2701_v44 }
  0x53   :  { %2556 = vmatprep.mubr.bf16.mxu0 %v2668_v18  ;;  %2313 = vmatpush3.bf16.msra.mxu0 %v2679_v19 }
  0x54   :  { %2314 = vmatprep.subr.bf16.mxu0 %v2682_v20  ;;  %2376 = vmatprep.subr.bf16.mxu1 %v2704_v49 }
  0x57   :  { %2315 = vmatpush3.bf16.msra.mxu0 %v2683_v21 }
  0x58   :  { %2316 = vmatprep.subr.bf16.mxu0 %v2686_v28 }
  0x5a   :  { %2557 = vmatmul.mubr.bf16.gmra.mxu0 %v2669_v22 }
  0x5b   :  { %2560 = vmatprep.mubr.bf16.mxu0 %v2670_v23  ;;  %2317 = vmatpush3.bf16.msra.mxu0 %v2687_v29  ;;  %v2706_v23 = vld [vmem:[#allocation8 + $0x138] sm:$0xff]   ;;  %v2708_v29 = vld [vmem:[#allocation8 + $0x170] sm:$0xff]  }
  0x5c   :  { %2318 = vmatprep.subr.bf16.mxu0 %v2690_v33 }
  0x5f   :  { %2319 = vmatpush3.bf16.msra.mxu0 %v2691_v34 }
  0x60   :  { %2320 = vmatprep.subr.bf16.mxu0 %v2694_v37 }
  0x62   :  { %2561 = vmatmul.mubr.bf16.gmra.mxu0 %v2671_v24 }
  0x63   :  { %2564 = vmatprep.mubr.bf16.mxu0 %v2672_v25  ;;  %2321 = vmatpush3.bf16.msra.mxu0 %v2695_v38 }
  0x64   :  { %2322 = vmatprep.subr.bf16.mxu0 %v2698_v41  ;;  %v2709_v41 = vld [vmem:[#allocation8 + $0x130] sm:$0xff]  }
  0x67   :  { %2323 = vmatpush3.bf16.msra.mxu0 %v2699_v42 }
  0x68   :  { %2324 = vmatprep.subr.bf16.mxu0 %v2702_v45 }
  0x6a   :  { %2565 = vmatmul.mubr.bf16.gmra.mxu0 %v2673_v26 }
  0x6b   :  { %2325 = vmatpush3.bf16.msra.mxu0 %v2703_v46 }
  0x6c   :  { %2326 = vmatprep.subr.bf16.mxu0 %v2705_v47 }
  0x6f   :  { %2327 = vmatpush3.bf16.msra.mxu0 %v2707_v48  ;;  %v2710_v48 = vld [vmem:[#allocation8 + $0x168] sm:$0xff]  }
  0x70   :  { %2440 = vmatprep.subr.bf16.mxu0 %v2714_v50 }
 0x112   :  { %v2554_v52 = vpop.f32.mrf.mxu0 }
 0x113   :  { %v326_v54 = vmul.f32 %v2554_v52, %v2994_v51 }
 0x114   :  { %v254_v55 = vpop.f32.mrf.mxu0 }
 0x115   :  { %v349_v56 = vadd.f32 %v2999_v53, %v326_v54  ;;  %v324_v57 = vmul.f32 %v2994_v51, %v254_v55  ;;  %v2715_v54 = vld [vmem:[#allocation8 + $0x1b8] sm:$0xff]  }
 0x116   :  { %v2555_v58 = vpop.f32.mrf.mxu0 }
 0x117   :  { %v3004_v59 = vmax.f32 %v349_v56, 0.0  ;;  %v347_v60 = vadd.f32 %v2999_v53, %v324_v57  ;;  %v327_v61 = vmul.f32 %v2555_v58, %v2994_v51  ;;  %v2718_v58 = vld [vmem:[#allocation8 + $0x1f0] sm:$0xff]  }
 0x118   :  { %v257_v62 = vpop.f32.mrf.mxu0 }
 0x119   :  { %423 = vst [vmem:[#allocation2 + $0x31] sm:$0xff] %v3004_v59  ;;  %v3009_v0 = vmax.f32 %v347_v60, 0.0  ;;  %v350_v1 = vadd.f32 %v2999_v53, %v327_v61  ;;  %v325_v2 = vmul.f32 %v2994_v51, %v257_v62  ;;  %v2711_v62 = vld [vmem:[#allocation8 + $0x128] sm:$0xff]  }
 0x11a   :  { %v2558_v3 = vpop.f32.mrf.mxu0 }
 0x11b   :  { %421 = vst [vmem:[#allocation2 + $0x11] sm:$0xff] %v3009_v0  ;;  %v3014_v4 = vmax.f32 %v350_v1, 0.0  ;;  %v348_v5 = vadd.f32 %v2999_v53, %v325_v2  ;;  %v330_v6 = vmul.f32 %v2558_v3, %v2994_v51  ;;  %v477_v7 = vpack.c.bf16 %v3009_v0, %v461_v63 }
 0x11c   :  { %v270_v8 = vpop.f32.mrf.mxu0 }
 0x11d   :  { %424 = vst [vmem:[#allocation2 + $0x41] sm:$0xff] %v3014_v4  ;;  %v3020_v9 = vmax.f32 %v348_v5, 0.0  ;;  %v353_v10 = vadd.f32 %v2999_v53, %v330_v6  ;;  %v328_v11 = vmul.f32 %v2994_v51, %v270_v8  ;;  %1262 = vmatprep.mubr.bf16.mxu1 %v477_v7  ;;  %v550_v12 = vpack.c.bf16 %v3014_v4, %v3004_v59  ;;  %v2712_v5 = vld [vmem:[#allocation8 + $0x160] sm:$0xff]   ;;  %v2719_v8 = vld [vmem:[#allocation8 + $0x1b0] sm:$0xff]  }
 0x11e   :  { %v2559_v13 = vpop.f32.mrf.mxu0 }
 0x11f   :  { %422 = vst [vmem:[#allocation2 + $0x21] sm:$0xff] %v3020_v9  ;;  %v3027_v14 = vmax.f32 %v353_v10, 0.0  ;;  %v351_v15 = vadd.f32 %v2999_v53, %v328_v11  ;;  %v331_v16 = vmul.f32 %v2559_v13, %v2994_v51  ;;  %v549_v18 = vpack.c.bf16 %v3020_v9, %v3009_v0  ;;  %v2742_v0 = vld [vmem:[#allocation8 + $0x218] sm:$0xff]  }
 0x120   :  { %v273_v17 = vpop.f32.mrf.mxu0  ;;  %v3046_v30 = vpack.c.bf16 %v3004_v59, %v3020_v9  ;;  %v511_v46 = vld [vmem:[#allocation2 + $0x30] sm:$0xff] }
 0x121   :  { %427 = vst [vmem:[#allocation2 + $0x71] sm:$0xff] %v3027_v14  ;;  %v3034_v19 = vmax.f32 %v351_v15, 0.0  ;;  %v354_v20 = vadd.f32 %v2999_v53, %v331_v16  ;;  %v329_v21 = vmul.f32 %v2994_v51, %v273_v17  ;;  %v2722_v16 = vld [vmem:[#allocation8 + $0x1e8] sm:$0xff]   ;;  %v613_v59 = vld [vmem:[#allocation2 + $0x91] sm:$0xff] }
 0x122   :  { %v438_v22 = vld [vmem:[#allocation2 + $0x10] sm:$0xff]  ;;  %v2562_v24 = vpop.f32.mrf.mxu0 }
 0x123   :  { %425 = vst [vmem:[#allocation2 + $0x51] sm:$0xff] %v3034_v19  ;;  %v3039_v25 = vmax.f32 %v354_v20, 0.0  ;;  %v352_v26 = vadd.f32 %v2999_v53, %v329_v21  ;;  %v453_v27 = vpack.c.bf16 %v438_v22, %v2868_v31  ;;  %v334_v28 = vmul.f32 %v2562_v24, %v2994_v51  ;;  %v3053_v37 = vld [vmem:[#allocation2 + $0x12] sm:$0xff]  ;;  %v2713_v21 = vld [vmem:[#allocation8 + $0x120] sm:$0xff]  }
 0x124   :  { %v286_v32 = vpop.f32.mrf.mxu0  ;;  %v3055_v38 = vld [vmem:[#allocation2 + $0x40] sm:$0xff]  ;;  %v501_v49 = vpack.c.bf16 %v3053_v37, %v485_v36  ;;  %v3083_v6 = vpack.c.bf16 %v3034_v19, %v3014_v4  ;;  %v2723_v36 = vld [vmem:[#allocation8 + $0x1a8] sm:$0xff]  }
 0x125   :  { %428 = vst [vmem:[#allocation2 + $0x81] sm:$0xff] %v3039_v25  ;;  %v3049_v33 = vmax.f32 %v352_v26, 0.0  ;;  %1263 = vmatmul.mubr.bf16.vlgmr.msra.gmra.mxu1 %v453_v27  ;;  %v357_v34 = vadd.f32 %v2999_v53, %v334_v28  ;;  %v332_v35 = vmul.f32 %v2994_v51, %v286_v32  ;;  %v552_v42 = vpack.c.bf16 %v3039_v25, %v3027_v14  ;;  %v3102_v27 = vld [vmem:[#allocation2 + $0x32] sm:$0xff]  ;;  %v2744_v4 = vld [vmem:[#allocation8 + $0x208] sm:$0xff]  }
 0x126   :  { %2377 = vmatpush3.bf16.msra.mxu1 %v2706_v23  ;;  %1270 = vmatprep.mubr.bf16.mxu1 %v3046_v30  ;;  %v510_v39 = vld [vmem:[#allocation2 + $0x20] sm:$0xff]  ;;  %v2563_v40 = vpop.f32.mrf.mxu0  ;;  %v526_v50 = vpack.c.bf16 %v3055_v38, %v511_v46 }
 0x127   :  { %426 = vst [vmem:[#allocation2 + $0x61] sm:$0xff] %v3049_v33  ;;  %v3061_v43 = vmax.f32 %v357_v34, 0.0  ;;  %v525_v44 = vpack.c.bf16 %v510_v39, %v438_v22  ;;  %v355_v45 = vadd.f32 %v2999_v53, %v332_v35  ;;  %v335_v47 = vmul.f32 %v2563_v40, %v2994_v51  ;;  %2378 = vmatprep.subr.bf16.mxu1 %v2708_v29  ;;  %v3091_v15 = vld [vmem:[#allocation2 + $0x22] sm:$0xff]  ;;  %v2716_v29 = vld [vmem:[#allocation8 + $0x158] sm:$0xff]  }
 0x128   :  { %v289_v52 = vpop.f32.mrf.mxu0  ;;  %v551_v60 = vpack.c.bf16 %v3049_v33, %v3034_v19  ;;  %v3078_v2 = vpack.c.bf16 %v511_v46, %v510_v39  ;;  %v3107_v32 = vpack.c.bf16 %v3102_v27, %v3091_v15  ;;  %v2717_v46 = vld [vmem:[#allocation8 + $0x118] sm:$0xff]  }
 0x129   :  { %431 = vst [vmem:[#allocation2 + $0xd1] sm:$0xff] %v3061_v43  ;;  %1359 = vmatprep.mubr.bf16.mxu0 %v525_v44  ;;  %v3068_v55 = vmax.f32 %v355_v45, 0.0  ;;  %v358_v56 = vadd.f32 %v2999_v53, %v335_v47  ;;  %v333_v57 = vmul.f32 %v2994_v51, %v289_v52  ;;  %v2727_v52 = vld [vmem:[#allocation8 + $0x1a0] sm:$0xff]  }
 0x12a   :  { %1360 = vmatmul.mubr.bf16.vlgmr.msra.gmra.mxu0 %v501_v49  ;;  %2379 = vmatpush3.bf16.msra.mxu1 %v2709_v41  ;;  %v2566_v61 = vpop.f32.mrf.mxu0  ;;  %v513_v17 = vld [vmem:[#allocation2 + $0x50] sm:$0xff]  ;;  %v2726_v41 = vld [vmem:[#allocation8 + $0x1e0] sm:$0xff]   ;;  %v3125_v49 = vpack.c.bf16 %v3027_v14, %v3049_v33 }
 0x12b   :  { %429 = vst [vmem:[#allocation2 + $0xb1] sm:$0xff] %v3068_v55  ;;  %1367 = vmatprep.mubr.bf16.mxu0 %v526_v50  ;;  %v3075_v63 = vmax.f32 %v358_v56, 0.0  ;;  %v356_v1 = vadd.f32 %v2999_v53, %v333_v57  ;;  %v338_v3 = vmul.f32 %v2566_v61, %v2994_v51  ;;  %2380 = vmatprep.subr.bf16.mxu1 %v2710_v48  ;;  %v2739_v61 = vld [vmem:[#allocation8 + $0x230] sm:$0xff]  }
 0x12c   :  { %v302_v7 = vpop.f32.mrf.mxu0  ;;  %2441 = vmatpush3.bf16.msra.mxu0 %v2715_v54  ;;  %v3120_v47 = vpack.c.bf16 %v513_v17, %v3055_v38  ;;  %v3130_v54 = vld [vmem:[#allocation2 + $0x52] sm:$0xff]  ;;  %v3135_v57 = vld [vmem:[#allocation2 + $0x80] sm:$0xff] }
 0x12d   :  { %432 = vst [vmem:[#allocation2 + $0xe1] sm:$0xff] %v3075_v63  ;;  %v3086_v10 = vmax.f32 %v356_v1, 0.0  ;;  %1271 = vmatmul.mubr.bf16.gmra.mxu1 %v3078_v2  ;;  %v361_v11 = vadd.f32 %v2999_v53, %v338_v3  ;;  %v336_v13 = vmul.f32 %v2994_v51, %v302_v7  ;;  %2442 = vmatprep.subr.bf16.mxu0 %v2718_v58  ;;  %v2728_v38 = vld [vmem:[#allocation8 + $0x1d8] sm:$0xff]   ;;  %v2721_v58 = vld [vmem:[#allocation8 + $0x110] sm:$0xff]   ;;  %v2724_v1 = vld [vmem:[#allocation8 + $0x148] sm:$0xff]  }
 0x12e   :  { %1278 = vmatprep.mubr.bf16.mxu1 %v3083_v6  ;;  %v3094_v20 = vld [vmem:[#allocation2 + $0x60] sm:$0xff]  ;;  %2381 = vmatpush3.bf16.msra.mxu1 %v2711_v62  ;;  %v2567_v22 = vpop.f32.mrf.mxu0  ;;  %v554_v23 = vpack.c.bf16 %v3075_v63, %v3061_v43  ;;  %v601_v19 = vpack.c.bf16 %v2868_v31, %v3135_v57 }
 0x12f   :  { %430 = vst [vmem:[#allocation2 + $0xc1] sm:$0xff] %v3086_v10  ;;  %v3099_v24 = vmax.f32 %v361_v11, 0.0  ;;  %v359_v26 = vadd.f32 %v2999_v53, %v336_v13  ;;  %v527_v28 = vpack.c.bf16 %v3094_v20, %v513_v17  ;;  %2382 = vmatprep.subr.bf16.mxu1 %v2712_v5  ;;  %v339_v34 = vmul.f32 %v2567_v22, %v2994_v51  ;;  %v3140_v62 = vld [vmem:[#allocation2 + $0x42] sm:$0xff]  ;;  %v2729_v5 = vld [vmem:[#allocation8 + $0x198] sm:$0xff]   ;;  %v2732_v13 = vld [vmem:[#allocation8 + $0x1d0] sm:$0xff]  }
 0x130   :  { %v305_v35 = vpop.f32.mrf.mxu0  ;;  %2443 = vmatpush3.bf16.msra.mxu0 %v2719_v8  ;;  %v553_v44 = vpack.c.bf16 %v3086_v10, %v3068_v55  ;;  %v3145_v3 = vpack.c.bf16 %v3130_v54, %v3140_v62  ;;  %v469_v11 = vld [vmem:[#allocation2 + $0xa1] sm:$0xff] }
 0x131   :  { %435 = vst [vmem:[#allocation2 + $0x111] sm:$0xff] %v3099_v24  ;;  %v3111_v39 = vmax.f32 %v359_v26, 0.0  ;;  %v337_v40 = vmul.f32 %v2994_v51, %v305_v35  ;;  %2444 = vmatprep.subr.bf16.mxu0 %v2722_v16  ;;  %v362_v45 = vadd.f32 %v2999_v53, %v339_v34  ;;  %v2720_v51 = vld [vmem:[#allocation8 + $0x150] sm:$0xff]   ;;  %v2725_v16 = vld [vmem:[#allocation8 + $0x108] sm:$0xff]   ;;  %v481_v22 = vpack.c.bf16 %v3068_v55, %v469_v11 }
 0x132   :  { %1368 = vmatmul.mubr.bf16.gmra.mxu0 %v3107_v32  ;;  %2383 = vmatpush3.bf16.msra.mxu1 %v2713_v21  ;;  %v2730_v21 = vld [vmem:[#allocation8 + $0x140] sm:$0xff]   ;;  %v517_v26 = vld [vmem:[#allocation2 + $0xb0] sm:$0xff] }
 0x133   :  { %433 = vst [vmem:[#allocation2 + $0xf1] sm:$0xff] %v3111_v39  ;;  %1375 = vmatprep.mubr.bf16.mxu0 %v527_v28  ;;  %v360_v48 = vadd.f32 %v2999_v53, %v337_v40  ;;  %2384 = vmatprep.subr.bf16.mxu1 %v2716_v29  ;;  %v3127_v50 = vmax.f32 %v362_v45, 0.0  ;;  %v515_v53 = vld [vmem:[#allocation2 + $0x70] sm:$0xff]  ;;  %v3156_v34 = vld [vmem:[#allocation2 + $0x62] sm:$0xff] }
 0x134   :  { %2445 = vmatpush3.bf16.msra.mxu0 %v2723_v36  ;;  %v528_v8 = vpack.c.bf16 %v3135_v57, %v515_v53  ;;  %v3152_v17 = vpack.c.bf16 %v515_v53, %v3094_v20  ;;  %v2733_v29 = vld [vmem:[#allocation8 + $0x190] sm:$0xff]   ;;  %v2734_v36 = vld [vmem:[#allocation8 + $0x1c8] sm:$0xff]   ;;  %v2731_v20 = vld [vmem:[#allocation8 + $0x100] sm:$0xff]  }
 0x135   :  { %1279 = vmatmul.mubr.bf16.gmra.mxu1 %v3120_v47  ;;  %v3132_v56 = vmax.f32 %v360_v48, 0.0  ;;  %2446 = vmatprep.subr.bf16.mxu0 %v2726_v41  ;;  %436 = vst [vmem:[#allocation2 + $0x121] sm:$0xff] %v3127_v50  ;;  %v3158_v35 = vld [vmem:[#allocation2 + $0x72] sm:$0xff]  ;;  %v2737_v48 = vld [vmem:[#allocation8 + $0x1c0] sm:$0xff]  }
 0x136   :  { %1286 = vmatprep.mubr.bf16.mxu1 %v3125_v49  ;;  %2385 = vmatpush3.bf16.msra.mxu1 %v2717_v46  ;;  %v518_v28 = vld [vmem:[#allocation2 + $0xc0] sm:$0xff]  ;;  %v2736_v41 = vld [vmem:[#allocation8 + $0x238] sm:$0xff]   ;;  %v3162_v45 = vpack.c.bf16 %v3158_v35, %v3156_v34  ;;  %v2735_v46 = vld [vmem:[#allocation8 + $0x188] sm:$0xff]  }
 0x137   :  { %434 = vst [vmem:[#allocation2 + $0x101] sm:$0xff] %v3132_v56  ;;  %2386 = vmatprep.subr.bf16.mxu1 %v2720_v51  ;;  %v555_v7 = vpack.c.bf16 %v3132_v56, %v3111_v39  ;;  %v529_v40 = vpack.c.bf16 %v518_v28, %v517_v26  ;;  %v457_v51 = vpack.c.bf16 %v517_v26, %v2868_v31  ;;  %v493_v53 = vld [vmem:[#allocation2 + $0xa2] sm:$0xff]  ;;  %v3183_v26 = vld [vmem:[#allocation2 + $0xd2] sm:$0xff] }
 0x138   :  { %2447 = vmatpush3.bf16.msra.mxu0 %v2727_v52  ;;  %v3168_v52 = vpack.c.bf16 %v3061_v43, %v3086_v10  ;;  %v564_v9 = vld [vmem:[#allocation2 + $0x82] sm:$0xff]  ;;  %v621_v55 = vld [vmem:[#allocation2 + $0x131] sm:$0xff]  ;;  %v3544_v43 = vpack.c.bf16 %v3127_v50, %v3099_v24 }
 0x139   :  { %2448 = vmatprep.subr.bf16.mxu0 %v2728_v38  ;;  %v2738_v38 = vld [vmem:[#allocation8 + $0x180] sm:$0xff]   ;;  %v637_v10 = vld [vmem:[#allocation2 + $0x92] sm:$0xff] }
 0x13a   :  { %1376 = vmatmul.mubr.bf16.gmra.mxu0 %v3145_v3  ;;  %2387 = vmatpush3.bf16.msra.mxu1 %v2721_v58  ;;  %v3170_v58 = vld [vmem:[#allocation2 + $0xb2] sm:$0xff] }
 0x13b   :  { %1383 = vmatprep.mubr.bf16.mxu0 %v528_v8  ;;  %2388 = vmatprep.subr.bf16.mxu1 %v2724_v1  ;;  %v519_v1 = vld [vmem:[#allocation2 + $0xd0] sm:$0xff]  ;;  %v505_v8 = vpack.c.bf16 %v3170_v58, %v493_v53 }
 0x13c   :  { %2449 = vmatpush3.bf16.msra.mxu0 %v2729_v5  ;;  %v520_v5 = vld [vmem:[#allocation2 + $0xe0] sm:$0xff] }
 0x13d   :  { %1287 = vmatmul.mubr.bf16.gmra.mxu1 %v3152_v17  ;;  %2450 = vmatprep.subr.bf16.mxu0 %v2732_v13  ;;  %v530_v11 = vpack.c.bf16 %v520_v5, %v519_v1  ;;  %v3174_v13 = vpack.c.bf16 %v519_v1, %v518_v28 }
 0x13e   :  { %1294 = vmatprep.mubr.bf16.mxu1 %v481_v22  ;;  %2389 = vmatpush3.bf16.msra.mxu1 %v2725_v16  ;;  %v3178_v16 = vpack.c.bf16 %v3111_v39, %v3075_v63  ;;  %v3181_v22 = vld [vmem:[#allocation2 + $0xc2] sm:$0xff] }
 0x13f   :  { %2390 = vmatprep.subr.bf16.mxu1 %v2730_v21  ;;  %v522_v21 = vld [vmem:[#allocation2 + $0x100] sm:$0xff] }
 0x140   :  { %2451 = vmatpush3.bf16.msra.mxu0 %v2733_v29  ;;  %v521_v29 = vld [vmem:[#allocation2 + $0xf0] sm:$0xff] }
 0x141   :  { %2452 = vmatprep.subr.bf16.mxu0 %v2734_v36  ;;  %v531_v36 = vpack.c.bf16 %v522_v21, %v521_v29  ;;  %v3191_v28 = vpack.c.bf16 %v521_v29, %v520_v5  ;;  %v3216_v29 = vld [vmem:[#allocation2 + $0x112] sm:$0xff] }
 0x142   :  { %1384 = vmatmul.mubr.bf16.gmra.mxu0 %v3162_v45  ;;  %2391 = vmatpush3.bf16.msra.mxu1 %v2731_v20  ;;  %v3188_v20 = vpack.c.bf16 %v3183_v26, %v3181_v22 }
 0x143   :  { %1391 = vmatprep.mubr.bf16.mxu0 %v529_v40  ;;  %2568 = vmatprep.subr.bf16.mxu1 %v2736_v41  ;;  %v3195_v40 = vpack.c.bf16 %v3099_v24, %v3132_v56  ;;  %v645_v24 = vld [vmem:[#allocation2 + $0x132] sm:$0xff] }
 0x144   :  { %2453 = vmatpush3.bf16.msra.mxu0 %v2735_v46  ;;  %v3198_v46 = vld [vmem:[#allocation2 + $0xe2] sm:$0xff] }
 0x145   :  { %1295 = vmatmul.mubr.bf16.gmra.mxu1 %v457_v51  ;;  %2454 = vmatprep.subr.bf16.mxu0 %v2737_v48  ;;  %v3200_v48 = vld [vmem:[#allocation2 + $0xf2] sm:$0xff]  ;;  %v578_v33 = vpack.c.bf16 %v3198_v46, %v3183_v26 }
 0x146   :  { %1302 = vmatprep.mubr.bf16.mxu1 %v3168_v52  ;;  %v523_v51 = vld [vmem:[#allocation2 + $0x110] sm:$0xff]  ;;  %v3207_v53 = vpack.c.bf16 %v3200_v48, %v3198_v46 }
 0x147   :  { %v3211_v5 = vpack.c.bf16 %v523_v51, %v522_v21  ;;  %v574_v21 = vpack.c.bf16 %v3140_v62, %v3102_v27  ;;  %v577_v27 = vpack.c.bf16 %v3181_v22, %v3170_v58  ;;  %v2751_v62 = vld [vmem:[#allocation9 + $0x10] sm:$0xff]  }
 0x148   :  { %2455 = vmatpush3.bf16.msra.mxu0 %v2738_v38  ;;  %v3203_v38 = vld [vmem:[#allocation2 + $0x120] sm:$0xff] }
 0x149   :  { %v532_v1 = vpack.c.bf16 %v3203_v38, %v523_v51  ;;  %v605_v63 = vpack.c.bf16 %v2868_v31, %v3203_v38  ;;  %v2747_v31 = vld [vmem:[#allocation9 + $0x30] sm:$0xff]  }
 0x14a   :  { %1392 = vmatmul.mubr.bf16.gmra.mxu0 %v505_v8  ;;  %v573_v8 = vpack.c.bf16 %v3091_v15, %v3053_v37  ;;  %v2740_v37 = vld [vmem:[#allocation8 + $0x228] sm:$0xff]   ;;  %v2741_v15 = vld [vmem:[#allocation8 + $0x220] sm:$0xff]  }
 0x14b   :  { %1399 = vmatprep.mubr.bf16.mxu0 %v530_v11  ;;  %v499_v11 = vld [vmem:[#allocation2 + $0x102] sm:$0xff] }
 0x14c   :  { %v579_v14 = vpack.c.bf16 %v499_v11, %v3200_v48 }
 0x14d   :  { %1303 = vmatmul.mubr.bf16.gmra.mxu1 %v3174_v13 }
 0x14e   :  { %1310 = vmatprep.mubr.bf16.mxu1 %v3178_v16 }
 0x152   :  { %1400 = vmatmul.mubr.bf16.gmra.mxu0 %v3188_v20 }
 0x153   :  { %1407 = vmatprep.mubr.bf16.mxu0 %v531_v36  ;;  %v3219_v36 = vpack.c.bf16 %v3216_v29, %v499_v11 }
 0x155   :  { %1311 = vmatmul.mubr.bf16.gmra.mxu1 %v3191_v28 }
 0x156   :  { %1318 = vmatprep.mubr.bf16.mxu1 %v3195_v40 }
 0x15a   :  { %1408 = vmatmul.mubr.bf16.gmra.mxu0 %v3207_v53 }
 0x15b   :  { %1415 = vmatprep.mubr.bf16.mxu0 %v532_v1 }
 0x15d   :  { %1319 = vmatmul.mubr.bf16.gmra.mxu1 %v3211_v5 }
 0x15e   :  { %1456 = vmatprep.mubr.bf16.mxu1 %v573_v8 }
 0x162   :  { %1416 = vmatmul.mubr.bf16.gmra.mxu0 %v3219_v36 }
 0x163   :  { %1553 = vmatprep.mubr.bf16.mxu0 %v3046_v30  ;;  %v575_v30 = vpack.c.bf16 %v3156_v34, %v3130_v54 }
 0x165   :  { %1457 = vmatmul.mubr.bf16.vlgmr.msra.gmra.mxu1 %v549_v18  ;;  %v2743_v18 = vld [vmem:[#allocation8 + $0x210] sm:$0xff]  }
 0x166   :  { %2569 = vmatpush3.bf16.msra.mxu1 %v2736_v41  ;;  %1464 = vmatprep.mubr.bf16.mxu1 %v574_v21 }
 0x167   :  { %2570 = vmatprep.subr.bf16.mxu1 %v2739_v61 }
 0x16a   :  { %1554 = vmatmul.mubr.bf16.vlgmr.msra.gmra.mxu0 %v3078_v2  ;;  %2571 = vmatpush3.bf16.msra.mxu1 %v2739_v61  ;;  %v576_v2 = vpack.c.bf16 %v564_v9, %v3158_v35 }
 0x16b   :  { %1561 = vmatprep.mubr.bf16.mxu0 %v3083_v6  ;;  %2572 = vmatprep.subr.bf16.mxu1 %v2740_v37  ;;  %v2745_v6 = vld [vmem:[#allocation8 + $0x200] sm:$0xff]  }
 0x16d   :  { %1465 = vmatmul.mubr.bf16.gmra.mxu1 %v550_v12  ;;  %v625_v12 = vpack.c.bf16 %v613_v59, %v3039_v25  ;;  %v572_v25 = vld [vmem:[#allocation2 + $0x122] sm:$0xff] }
 0x16e   :  { %1472 = vmatprep.mubr.bf16.mxu1 %v575_v30  ;;  %2573 = vmatpush3.bf16.msra.mxu1 %v2740_v37  ;;  %v653_v39 = vpack.c.bf16 %v645_v24, %v572_v25 }
 0x16f   :  { %2574 = vmatprep.subr.bf16.mxu1 %v2741_v15 }
 0x172   :  { %1562 = vmatmul.mubr.bf16.gmra.mxu0 %v3120_v47  ;;  %2575 = vmatpush3.bf16.msra.mxu1 %v2741_v15  ;;  %v2749_v47 = vld [vmem:[#allocation9 + $0x20] sm:$0xff]  }
 0x173   :  { %1569 = vmatprep.mubr.bf16.mxu0 %v3125_v49  ;;  %2576 = vmatprep.subr.bf16.mxu1 %v2742_v0 }
 0x175   :  { %1473 = vmatmul.mubr.bf16.gmra.mxu1 %v551_v60  ;;  %v629_v60 = vpack.c.bf16 %v621_v55, %v3127_v50  ;;  %v2750_v50 = vld [vmem:[#allocation9 + $0x18] sm:$0xff]  }
 0x176   :  { %1480 = vmatprep.mubr.bf16.mxu1 %v576_v2  ;;  %2577 = vmatpush3.bf16.msra.mxu1 %v2742_v0 }
 0x177   :  { %2578 = vmatprep.subr.bf16.mxu1 %v2743_v18 }
 0x17a   :  { %1570 = vmatmul.mubr.bf16.gmra.mxu0 %v3152_v17  ;;  %2579 = vmatpush3.bf16.msra.mxu1 %v2743_v18 }
 0x17b   :  { %1577 = vmatprep.mubr.bf16.mxu0 %v625_v12  ;;  %2580 = vmatprep.subr.bf16.mxu1 %v2744_v4 }
 0x17d   :  { %1481 = vmatmul.mubr.bf16.gmra.mxu1 %v552_v42  ;;  %v580_v42 = vpack.c.bf16 %v572_v25, %v3216_v29 }
 0x17e   :  { %1488 = vmatprep.mubr.bf16.mxu1 %v577_v27  ;;  %2581 = vmatpush3.bf16.msra.mxu1 %v2744_v4 }
 0x17f   :  { %2582 = vmatprep.subr.bf16.mxu1 %v2745_v6 }
 0x182   :  { %1578 = vmatmul.mubr.bf16.gmra.mxu0 %v601_v19  ;;  %2583 = vmatpush3.bf16.msra.mxu1 %v2745_v6 }
 0x183   :  { %1585 = vmatprep.mubr.bf16.mxu0 %v3168_v52 }
 0x185   :  { %1489 = vmatmul.mubr.bf16.gmra.mxu1 %v553_v44  ;;  %v2748_v44 = vld [vmem:[#allocation9 + $0x28] sm:$0xff]  }
 0x186   :  { %1496 = vmatprep.mubr.bf16.mxu1 %v578_v33 }
 0x18a   :  { %1586 = vmatmul.mubr.bf16.gmra.mxu0 %v3174_v13 }
 0x18b   :  { %1593 = vmatprep.mubr.bf16.mxu0 %v3178_v16 }
 0x18d   :  { %1497 = vmatmul.mubr.bf16.gmra.mxu1 %v554_v23  ;;  %v649_v23 = vpack.c.bf16 %v637_v10, %v564_v9 }
 0x18e   :  { %1504 = vmatprep.mubr.bf16.mxu1 %v579_v14 }
 0x192   :  { %1594 = vmatmul.mubr.bf16.gmra.mxu0 %v3191_v28  ;;  %v2753_v28 = vld [vmem:[#allocation9] sm:$0xff]  }
 0x193   :  { %1601 = vmatprep.mubr.bf16.mxu0 %v3195_v40 }
 0x195   :  { %1505 = vmatmul.mubr.bf16.gmra.mxu1 %v555_v7 }
 0x196   :  { %1512 = vmatprep.mubr.bf16.mxu1 %v580_v42 }
 0x19a   :  { %1602 = vmatmul.mubr.bf16.gmra.mxu0 %v3211_v5 }
 0x19b   :  { %1609 = vmatprep.mubr.bf16.mxu0 %v629_v60 }
 0x19d   :  { %1513 = vmatmul.mubr.bf16.gmra.mxu1 %v3544_v43 }
 0x19e   :  { %2584 = vmatprep.mubr.bf16.mxu1 %v3107_v32  ;;  %v2746_v32 = vld [vmem:[#allocation9 + $0x38] sm:$0xff]  }
 0x19f   :  { %2600 = vmatprep.subr.bf16.mxu0 %v2746_v32  ;;  %2632 = vmatprep.subr.bf16.mxu1 %v2746_v32 }
 0x1a0   :  { %2601 = vmatpush3.bf16.msra.mxu0 %v2746_v32 }
 0x1a1   :  { %2602 = vmatprep.subr.bf16.mxu0 %v2747_v31 }
 0x1a2   :  { %1610 = vmatmul.mubr.bf16.gmra.mxu0 %v605_v63 }
 0x1a4   :  { %2603 = vmatpush3.bf16.msra.mxu0 %v2747_v31 }
 0x1a5   :  { %2585 = vmatmul.mubr.bf16.vlgmr.msra.gmra.mxu1 %v3145_v3  ;;  %2604 = vmatprep.subr.bf16.mxu0 %v2748_v44 }
 0x1a6   :  { %2588 = vmatprep.mubr.bf16.mxu1 %v3162_v45  ;;  %2640 = vmatpush3.bf16.msra.mxu1 %v2746_v32  ;;  %v2752_v45 = vld [vmem:[#allocation9 + $0x8] sm:$0xff]  }
 0x1a7   :  { %2633 = vmatprep.subr.bf16.mxu1 %v2747_v31 }
 0x1a8   :  { %2605 = vmatpush3.bf16.msra.mxu0 %v2748_v44 }
 0x1a9   :  { %2606 = vmatprep.subr.bf16.mxu0 %v2749_v47 }
 0x1aa   :  { %2641 = vmatpush3.bf16.msra.mxu1 %v2747_v31 }
 0x1ab   :  { %2634 = vmatprep.subr.bf16.mxu1 %v2748_v44 }
 0x1ac   :  { %2607 = vmatpush3.bf16.msra.mxu0 %v2749_v47 }
 0x1ad   :  { %2589 = vmatmul.mubr.bf16.gmra.mxu1 %v649_v23  ;;  %2608 = vmatprep.subr.bf16.mxu0 %v2750_v50 }
 0x1ae   :  { %2592 = vmatprep.mubr.bf16.mxu1 %v3188_v20  ;;  %2642 = vmatpush3.bf16.msra.mxu1 %v2748_v44 }
 0x1af   :  { %2635 = vmatprep.subr.bf16.mxu1 %v2749_v47 }
 0x1b0   :  { %2609 = vmatpush3.bf16.msra.mxu0 %v2750_v50 }
 0x1b1   :  { %2610 = vmatprep.subr.bf16.mxu0 %v2751_v62 }
 0x1b2   :  { %2643 = vmatpush3.bf16.msra.mxu1 %v2749_v47 }
 0x1b3   :  { %2636 = vmatprep.subr.bf16.mxu1 %v2750_v50 }
 0x1b4   :  { %2611 = vmatpush3.bf16.msra.mxu0 %v2751_v62 }
 0x1b5   :  { %2593 = vmatmul.mubr.bf16.gmra.mxu1 %v3207_v53  ;;  %2612 = vmatprep.subr.bf16.mxu0 %v2752_v45 }
 0x1b6   :  { %2596 = vmatprep.mubr.bf16.mxu1 %v3219_v36  ;;  %2644 = vmatpush3.bf16.msra.mxu1 %v2750_v50 }
 0x1b7   :  { %2637 = vmatprep.subr.bf16.mxu1 %v2751_v62 }
 0x1b8   :  { %2613 = vmatpush3.bf16.msra.mxu0 %v2752_v45 }
 0x1b9   :  { %2614 = vmatprep.subr.bf16.mxu0 %v2753_v28 }
 0x1ba   :  { %2645 = vmatpush3.bf16.msra.mxu1 %v2751_v62 }
 0x1bb   :  { %2638 = vmatprep.subr.bf16.mxu1 %v2752_v45 }
 0x1bc   :  { %2615 = vmatpush3.bf16.msra.mxu0 %v2753_v28 }
 0x1bd   :  { %2597 = vmatmul.mubr.bf16.gmra.mxu1 %v653_v39 }
 0x1be   :  { %2646 = vmatpush3.bf16.msra.mxu1 %v2752_v45 }
 0x1bf   :  { %2639 = vmatprep.subr.bf16.mxu1 %v2753_v28 }
 0x1c2   :  { %2647 = vmatpush3.bf16.msra.mxu1 %v2753_v28 }
 0x1e5   :  { %v2264_v49 = vpop.f32.mrf.mxu1 }
 0x1e7   :  { %v2265_v54 = vpop.f32.mrf.mxu1 }
 0x1e8   :  { %v2266_v56 = vadd.f32 %v2265_v54, %v2264_v49 }
 0x1e9   :  { %v2267_v57 = vpop.f32.mrf.mxu1 }
 0x1ea   :  { %v2328_v61 = vpop.f32.mrf.mxu0 }
 0x1eb   :  { %v2268_v3 = vpop.f32.mrf.mxu1 }
 0x1ec   :  { %v2269_v7 = vadd.f32 %v2268_v3, %v2267_v57  ;;  %v2329_v17 = vpop.f32.mrf.mxu0 }
 0x1ed   :  { %v2330_v34 = vadd.f32 %v2329_v17, %v2328_v61  ;;  %v2270_v35 = vpop.f32.mrf.mxu1 }
 0x1ee   :  { %v2331_v41 = vpop.f32.mrf.mxu0 }
 0x1ef   :  { %v3281_v52 = vadd.f32 %v2330_v34, %v2266_v56  ;;  %v2271_v58 = vpop.f32.mrf.mxu1 }
 0x1f0   :  { %v2272_v13 = vadd.f32 %v2271_v58, %v2270_v35  ;;  %v2332_v16 = vpop.f32.mrf.mxu0 }
 0x1f1   :  { %v2333_v22 = vadd.f32 %v2332_v16, %v2331_v41  ;;  %v2273_v26 = vpop.f32.mrf.mxu1 }
 0x1f2   :  { %v2334_v20 = vpop.f32.mrf.mxu0 }
 0x1f3   :  { %v3283_v40 = vadd.f32 %v2333_v22, %v2269_v7  ;;  %v2274_v46 = vpop.f32.mrf.mxu1 }
 0x1f4   :  { %v2275_v48 = vadd.f32 %v2274_v46, %v2273_v26  ;;  %v2335_v51 = vpop.f32.mrf.mxu0 }
 0x1f5   :  { %v2336_v38 = vadd.f32 %v2335_v51, %v2334_v20  ;;  %v2276_v53 = vpop.f32.mrf.mxu1 }
 0x1f6   :  { %v2337_v1 = vpop.f32.mrf.mxu0 }
 0x1f7   :  { %v3285_v5 = vadd.f32 %v2336_v38, %v2272_v13  ;;  %v2277_v8 = vpop.f32.mrf.mxu1 }
 0x1f8   :  { %v2278_v11 = vadd.f32 %v2277_v8, %v2276_v53  ;;  %v2338_v29 = vpop.f32.mrf.mxu0 }
 0x1f9   :  { %v2339_v36 = vadd.f32 %v2338_v29, %v2337_v1  ;;  %v2279_v21 = vpop.f32.mrf.mxu1 }
 0x1fa   :  { %v2340_v37 = vpop.f32.mrf.mxu0 }
 0x1fb   :  { %v3287_v15 = vadd.f32 %v2339_v36, %v2275_v48  ;;  %v2280_v30 = vpop.f32.mrf.mxu1 }
 0x1fc   :  { %v2281_v0 = vadd.f32 %v2280_v30, %v2279_v21  ;;  %v2341_v9 = vpop.f32.mrf.mxu0 }
 0x1fd   :  { %v2342_v18 = vadd.f32 %v2341_v9, %v2340_v37  ;;  %v2282_v2 = vpop.f32.mrf.mxu1 }
 0x1fe   :  { %v2343_v59 = vpop.f32.mrf.mxu0 }
 0x1ff   :  { %v3289_v4 = vadd.f32 %v2342_v18, %v2278_v11  ;;  %v2283_v12 = vpop.f32.mrf.mxu1 }
 0x200   :  { %v2284_v6 = vadd.f32 %v2283_v12, %v2282_v2  ;;  %v2344_v27 = vpop.f32.mrf.mxu0 }
 0x201   :  { %v2345_v19 = vadd.f32 %v2344_v27, %v2343_v59  ;;  %v2285_v33 = vpop.f32.mrf.mxu1 }
 0x202   :  { %v2346_v14 = vpop.f32.mrf.mxu0 }
 0x203   :  { %v3291_v25 = vadd.f32 %v2345_v19, %v2281_v0  ;;  %v2286_v42 = vpop.f32.mrf.mxu1 }
 0x204   :  { %v2287_v55 = vadd.f32 %v2286_v42, %v2285_v33  ;;  %v2347_v60 = vpop.f32.mrf.mxu0 }
 0x205   :  { %v2348_v43 = vadd.f32 %v2347_v60, %v2346_v14  ;;  %v2288_v63 = vpop.f32.mrf.mxu1 }
 0x206   :  { %v2349_v10 = vpop.f32.mrf.mxu0 }
 0x207   :  { %v3293_v23 = vadd.f32 %v2348_v43, %v2284_v6  ;;  %v2289_v24 = vpop.f32.mrf.mxu1 }
 0x208   :  { %v2290_v39 = vadd.f32 %v2289_v24, %v2288_v63  ;;  %v2350_v32 = vpop.f32.mrf.mxu0 }
 0x209   :  { %v2351_v31 = vadd.f32 %v2350_v32, %v2349_v10  ;;  %v2291_v44 = vpop.f32.mrf.mxu1 }
 0x20a   :  { %v2352_v47 = vpop.f32.mrf.mxu0 }
 0x20b   :  { %v3295_v49 = vadd.f32 %v2351_v31, %v2287_v55  ;;  %v2292_v50 = vpop.f32.mrf.mxu1 }
 0x20c   :  { %v2293_v54 = vadd.f32 %v2292_v50, %v2291_v44  ;;  %v2353_v56 = vpop.f32.mrf.mxu0 }
 0x20d   :  { %v2354_v57 = vadd.f32 %v2353_v56, %v2352_v47  ;;  %v2294_v61 = vpop.f32.mrf.mxu1 }
 0x20e   :  { %v2355_v62 = vpop.f32.mrf.mxu0 }
 0x20f   :  { %v3297_v3 = vadd.f32 %v2354_v57, %v2290_v39  ;;  %v2295_v7 = vpop.f32.mrf.mxu1 }
 0x210   :  { %v2296_v17 = vadd.f32 %v2295_v7, %v2294_v61  ;;  %v2356_v34 = vpop.f32.mrf.mxu0 }
 0x211   :  { %v2357_v35 = vadd.f32 %v2356_v34, %v2355_v62  ;;  %v2297_v41 = vpop.f32.mrf.mxu1 }
 0x212   :  { %v2358_v45 = vpop.f32.mrf.mxu0 }
 0x213   :  { %v3299_v58 = vadd.f32 %v2357_v35, %v2293_v54  ;;  %v2298_v13 = vpop.f32.mrf.mxu1 }
 0x214   :  { %v2299_v16 = vadd.f32 %v2298_v13, %v2297_v41  ;;  %v2359_v22 = vpop.f32.mrf.mxu0 }
 0x215   :  { %3545 = vst [vmem:[#allocation16_spill] sm:$0xff] %v3299_v58  ;;  %v2360_v26 = vadd.f32 %v2359_v22, %v2358_v45  ;;  %v2300_v20 = vpop.f32.mrf.mxu1 }
 0x216   :  { %v2361_v28 = vpop.f32.mrf.mxu0 }
 0x217   :  { %v3301_v46 = vadd.f32 %v2360_v26, %v2296_v17  ;;  %v2301_v48 = vpop.f32.mrf.mxu1 }
 0x218   :  { %v2302_v51 = vadd.f32 %v2301_v48, %v2300_v20  ;;  %v2362_v38 = vpop.f32.mrf.mxu0 }
 0x219   :  { %3546 = vst [vmem:[#allocation17_spill] sm:$0xff] %v3301_v46  ;;  %v2363_v53 = vadd.f32 %v2362_v38, %v2361_v28  ;;  %v2303_v1 = vpop.f32.mrf.mxu1 }
 0x21a   :  { %v2364_v8 = vpop.f32.mrf.mxu0 }
 0x21b   :  { %v3303_v11 = vadd.f32 %v2363_v53, %v2299_v16  ;;  %v2304_v29 = vpop.f32.mrf.mxu1 }
 0x21c   :  { %v2305_v36 = vadd.f32 %v2304_v29, %v2303_v1  ;;  %v2365_v21 = vpop.f32.mrf.mxu0 }
 0x21d   :  { %3547 = vst [vmem:[#allocation18_spill] sm:$0xff] %v3303_v11  ;;  %v2366_v37 = vadd.f32 %v2365_v21, %v2364_v8  ;;  %v2306_v30 = vpop.f32.mrf.mxu1 }
 0x21e   :  { %v2367_v0 = vpop.f32.mrf.mxu0 }
 0x21f   :  { %v3305_v9 = vadd.f32 %v2366_v37, %v2302_v51  ;;  %v2307_v18 = vpop.f32.mrf.mxu1 }
 0x220   :  { %v2308_v2 = vadd.f32 %v2307_v18, %v2306_v30  ;;  %v2368_v59 = vpop.f32.mrf.mxu0 }
 0x221   :  { %3548 = vst [vmem:[#allocation19_spill] sm:$0xff] %v3305_v9  ;;  %v2369_v12 = vadd.f32 %v2368_v59, %v2367_v0  ;;  %v2309_v6 = vpop.f32.mrf.mxu1 }
 0x222   :  { %v2370_v27 = vpop.f32.mrf.mxu0 }
 0x223   :  { %v3307_v19 = vadd.f32 %v2369_v12, %v2305_v36  ;;  %v2310_v33 = vpop.f32.mrf.mxu1 }
 0x224   :  { %v3309_v14 = vadd.f32 %v2310_v33, %v2309_v6  ;;  %v2371_v42 = vpop.f32.mrf.mxu0 }
 0x225   :  { %3549 = vst [vmem:[#allocation20_spill] sm:$0xff] %v3307_v19  ;;  %v2372_v55 = vadd.f32 %v2371_v42, %v2370_v27  ;;  %v2392_v60 = vpop.f32.mrf.mxu1 }
 0x226   :  { %v3311_v43 = vpop.f32.mrf.mxu0 }
 0x227   :  { %v3313_v63 = vadd.f32 %v2372_v55, %v2308_v2  ;;  %v2393_v10 = vpop.f32.mrf.mxu1 }
 0x228   :  { %v3315_v24 = vpop.f32.mrf.mxu0  ;;  %v2394_v39 = vadd.f32 %v2393_v10, %v2392_v60 }
 0x229   :  { %3550 = vst [vmem:[#allocation21_spill] sm:$0xff] %v3313_v63  ;;  %v2395_v32 = vpop.f32.mrf.mxu1 }
 0x22a   :  { %v3318_v31 = vadd.f32 %v2394_v39, %v3281_v52  ;;  %v2456_v44 = vpop.f32.mrf.mxu0 }
 0x22b   :  { %v2396_v47 = vpop.f32.mrf.mxu1 }
 0x22c   :  { %v2457_v50 = vpop.f32.mrf.mxu0 }
 0x22d   :  { %v2398_v54 = vpop.f32.mrf.mxu1 }
 0x22e   :  { %v3320_v56 = vpop.f32.mrf.mxu0 }
 0x22f   :  { %v2399_v57 = vpop.f32.mrf.mxu1 }
 0x230   :  { %v2460_v61 = vpop.f32.mrf.mxu0 }
 0x231   :  { %v2401_v62 = vpop.f32.mrf.mxu1 }
 0x232   :  { %v2462_v7 = vpop.f32.mrf.mxu0 }
 0x233   :  { %v2402_v17 = vpop.f32.mrf.mxu1 }
 0x234   :  { %v2463_v34 = vpop.f32.mrf.mxu0 }
 0x235   :  { %v2404_v35 = vpop.f32.mrf.mxu1 }
 0x236   :  { %v2465_v41 = vpop.f32.mrf.mxu0 }
 0x237   :  { %v2405_v45 = vpop.f32.mrf.mxu1 }
 0x238   :  { %v2466_v13 = vpop.f32.mrf.mxu0 }
 0x239   :  { %v2407_v16 = vpop.f32.mrf.mxu1 }
 0x23a   :  { %v3322_v22 = vpop.f32.mrf.mxu0 }
 0x23b   :  { %v2408_v52 = vpop.f32.mrf.mxu1 }
 0x23c   :  { %v3324_v26 = vpop.f32.mrf.mxu0 }
 0x23d   :  { %v2410_v20 = vpop.f32.mrf.mxu1 }
 0x23e   :  { %v2471_v28 = vpop.f32.mrf.mxu0 }
 0x23f   :  { %v2411_v48 = vpop.f32.mrf.mxu1 }
 0x240   :  { %v2472_v51 = vpop.f32.mrf.mxu0 }
 0x241   :  { %v3326_v38 = vpop.f32.mrf.mxu1 }
 0x242   :  { %v2474_v53 = vpop.f32.mrf.mxu0 }
 0x243   :  { %v3328_v1 = vpop.f32.mrf.mxu1 }
 0x244   :  { %v2475_v8 = vpop.f32.mrf.mxu0 }
 0x245   :  { %v3330_v29 = vpop.f32.mrf.mxu1 }
 0x246   :  { %v3332_v36 = vpop.f32.mrf.mxu0 }
 0x247   :  { %v3334_v21 = vpop.f32.mrf.mxu1 }
 0x248   :  { %v3336_v37 = vpop.f32.mrf.mxu0 }
 0x249   :  { %v3338_v30 = vpop.f32.mrf.mxu1 }
 0x24a   :  { %v3340_v0 = vpop.f32.mrf.mxu0 }
 0x24b   :  { %3551 = vst [vmem:[#allocation22_spill] sm:$0xff] %v3340_v0  ;;  %v3342_v18 = vpop.f32.mrf.mxu1 }
 0x24c   :  { %v3344_v2 = vpop.f32.mrf.mxu0 }
 0x24d   :  { %3552 = vst [vmem:[#allocation23_spill] sm:$0xff] %v3344_v2  ;;  %v3346_v59 = vpop.f32.mrf.mxu1 }
 0x24e   :  { %v3348_v12 = vpop.f32.mrf.mxu0 }
 0x24f   :  { %3553 = vst [vmem:[#allocation24_spill] sm:$0xff] %v3348_v12  ;;  %v3350_v6 = vpop.f32.mrf.mxu1 }
 0x250   :  { %v3352_v27 = vpop.f32.mrf.mxu0 }
 0x251   :  { %3554 = vst [vmem:[#allocation25_spill] sm:$0xff] %v3352_v27  ;;  %v3354_v33 = vpop.f32.mrf.mxu1  ;;  %v2400_v27 = vadd.f32 %v2399_v57, %v2398_v54  ;;  %v2375_v54 = vadd.f32 %v3315_v24, %v3311_v43  ;;  %v2409_v43 = vadd.f32 %v2408_v52, %v2407_v16  ;;  %v2418_v52 = vadd.f32 %v3334_v21, %v3330_v29 }
 0x252   :  { %3555 = vst [vmem:[#allocation26_spill] sm:$0xff] %v3354_v33  ;;  %v3356_v42 = vpop.f32.mrf.mxu0  ;;  %v2458_v33 = vadd.f32 %v2457_v50, %v2456_v44  ;;  %v3392_v44 = vld [vmem:[%s3538_s5] ss:$0 sm:$0xff] }
 0x253   :  { %v3358_v55 = vpop.f32.mrf.mxu1  ;;  %v1478_v16 = vadd.f32 %v2409_v43, %v3291_v25 }
 0x254   :  { %3556 = vst [vmem:[#allocation27_spill] sm:$0xff] %v3358_v55  ;;  %v3360_v60 = vpop.f32.mrf.mxu0  ;;  %v2464_v55 = vadd.f32 %v2463_v34, %v2462_v7  ;;  %v1556_v50 = vadd.f32 %v2458_v33, %v3318_v31  ;;  %v2406_v34 = vadd.f32 %v2405_v45, %v2404_v35  ;;  %v3402_v31 = vadd.f32 %v2375_v54, %v3309_v14 }
 0x255   :  { %v3362_v10 = vpop.f32.mrf.mxu1 }
 0x256   :  { %3557 = vst [vmem:[#allocation28_spill] sm:$0xff] %v3362_v10  ;;  %v3364_v39 = vpop.f32.mrf.mxu0  ;;  %v1475_v14 = vadd.f32 %v2406_v34, %v3289_v4  ;;  %v2424_v4 = vadd.f32 %v3350_v6, %v3346_v59 }
 0x257   :  { %3558 = vst [vmem:[#allocation29_spill] sm:$0xff] %v3364_v39  ;;  %v3366_v19 = vpop.f32.mrf.mxu1  ;;  %v1467_v39 = vadd.f32 %v2400_v27, %v3285_v5  ;;  %v2461_v5 = vadd.f32 %v2460_v61, %v3320_v56  ;;  %v3409_v56 = vld [vmem:[%s3539_s6] ss:$0 sm:$0xff] }
 0x258   :  { %3559 = vst [vmem:[#allocation30_spill] sm:$0xff] %v3366_v19  ;;  %v3370_v9 = vpop.f32.mrf.mxu0  ;;  %v2403_v19 = vadd.f32 %v2402_v17, %v2401_v62 }
 0x259   :  { %v3368_v63 = vpop.f32.mrf.mxu1  ;;  %3561 = vst [vmem:[#allocation32_spill] sm:$0xff] %v3370_v9  ;;  %v1564_v0 = vadd.f32 %v2464_v55, %v1467_v39  ;;  %v1491_v39 = vadd.f32 %v2418_v52, %v3297_v3 }
 0x25a   :  { %3560 = vst [vmem:[#allocation31_spill] sm:$0xff] %v3368_v63  ;;  %v3376_v12 = vpop.f32.mrf.mxu0  ;;  %v2397_v63 = vadd.f32 %v2396_v47, %v2395_v32  ;;  %v1470_v62 = vadd.f32 %v2403_v19, %v3287_v15  ;;  %v2412_v32 = vadd.f32 %v2411_v48, %v2410_v20  ;;  %v2470_v15 = vadd.f32 %v3324_v26, %v3322_v22 }
 0x25b   :  { %v3372_v11 = vpop.f32.mrf.mxu1  ;;  %v2473_v19 = vadd.f32 %v2472_v51, %v2471_v28  ;;  %v2415_v22 = vadd.f32 %v3328_v1, %v3326_v38  ;;  %v2479_v51 = vadd.f32 %v3336_v37, %v3332_v36  ;;  %v2421_v36 = vadd.f32 %v3342_v18, %v3338_v30  ;;  %v3567_v30 = vld [vmem:[#allocation17_spill] sm:$0xff] }
 0x25c   :  { %3562 = vst [vmem:[#allocation33_spill] sm:$0xff] %v3372_v11  ;;  %v3383_v2 = vpop.f32.mrf.mxu0  ;;  %v2467_v11 = vadd.f32 %v2466_v13, %v2465_v41  ;;  %v1462_v17 = vadd.f32 %v2397_v63, %v3283_v40  ;;  %v2476_v41 = vadd.f32 %v2475_v8, %v2474_v53  ;;  %v1483_v63 = vadd.f32 %v2412_v32, %v3293_v23 }
 0x25d   :  { %v3374_v58 = vpop.f32.mrf.mxu1  ;;  %v1572_v53 = vadd.f32 %v2470_v15, %v1475_v14  ;;  %v1575_v8 = vadd.f32 %v2473_v19, %v1478_v16  ;;  %v1486_v33 = vadd.f32 %v2415_v22, %v3295_v49  ;;  %v2488_v37 = vadd.f32 %v3360_v60, %v3356_v42 }
 0x25e   :  { %v3397_v47 = vpop.f32.mrf.mxu0  ;;  %v1567_v55 = vadd.f32 %v2467_v11, %v1470_v62  ;;  %v1559_v45 = vadd.f32 %v2461_v5, %v1462_v17  ;;  %v1580_v48 = vadd.f32 %v2476_v41, %v1483_v63  ;;  %v3563_v5 = vld [vmem:[#allocation22_spill] sm:$0xff]  ;;  %v3564_v62 = vld [vmem:[#allocation23_spill] sm:$0xff]  ;;  %v1499_v18 = vadd.f32 %v2424_v4, %v3567_v30  ;;  %v3570_v15 = vld [vmem:[#allocation29_spill] sm:$0xff] }
 0x25f   :  { %v3378_v46 = vpop.f32.mrf.mxu1  ;;  %v2482_v32 = vadd.f32 %v3564_v62, %v3563_v5  ;;  %v3566_v17 = vld [vmem:[#allocation27_spill] sm:$0xff]  ;;  %v1583_v34 = vadd.f32 %v2479_v51, %v1486_v33  ;;  %v2494_v5 = vadd.f32 %v3383_v2, %v3376_v12 }
 0x260   :  { %v3412_v61 = vpop.f32.mrf.mxu0  ;;  %v3571_v19 = vld [vmem:[#allocation32_spill] sm:$0xff]  ;;  %v1596_v22 = vadd.f32 %v2488_v37, %v1499_v18 }
 0x261   :  { %v3380_v10 = vpop.f32.mrf.mxu1 }
 0x262   :  { %v2498_v38 = vpop.f32.mrf.mxu0 }
 0x263   :  { %v3385_v9 = vpop.f32.mrf.mxu1  ;;  %v3579_v30 = vld [vmem:[#allocation33_spill] sm:$0xff] }
 0x265   :  { %v2586_v57 = vpop.f32.mrf.mxu1 }
 0x266   :  { %v1661_v7 = vadd.f32 %v2586_v57, %v1564_v0 }
 0x267   :  { %v1652_v24 = vpop.f32.mrf.mxu1 }
 0x268   :  { %v1724_v13 = vmul.f32 %v3392_v44, %v1661_v7  ;;  %v1653_v27 = vadd.f32 %v1652_v24, %v1556_v50  ;;  %v3565_v7 = vld [vmem:[#allocation26_spill] sm:$0xff]  ;;  %v2499_v24 = vpop.f32.mrf.mxu0 }
 0x269   :  { %v2587_v40 = vpop.f32.mrf.mxu1  ;;  %v2427_v49 = vadd.f32 %v3566_v17, %v3565_v7  ;;  %v3577_v7 = vld [vmem:[#allocation21_spill] sm:$0xff] }
 0x26a   :  { %v1722_v35 = vmul.f32 %v3392_v44, %v1653_v27  ;;  %v1664_v11 = vadd.f32 %v2587_v40, %v1567_v55  ;;  %v1747_v20 = vadd.f32 %v3409_v56, %v1724_v13  ;;  %v3568_v13 = vld [vmem:[#allocation24_spill] sm:$0xff]  ;;  %v3569_v27 = vld [vmem:[#allocation25_spill] sm:$0xff]  ;;  %v2491_v40 = vadd.f32 %v3571_v19, %v3570_v15 }
 0x26b   :  { %v1655_v26 = vpop.f32.mrf.mxu1  ;;  %v2485_v55 = vadd.f32 %v3569_v27, %v3568_v13 }
 0x26c   :  { %v1725_v23 = vmul.f32 %v3392_v44, %v1664_v11  ;;  %v1656_v28 = vadd.f32 %v1655_v26, %v1559_v45  ;;  %v1745_v1 = vadd.f32 %v3409_v56, %v1722_v35  ;;  %v1763_v6 = vmax.f32 %v1747_v20, 0.0  ;;  %v3572_v45 = vld [vmem:[#allocation16_spill] sm:$0xff]  ;;  %v3573_v26 = vld [vmem:[#allocation18_spill] sm:$0xff] }
 0x26d   :  { %v2590_v25 = vpop.f32.mrf.mxu1  ;;  %v1494_v14 = vadd.f32 %v2421_v36, %v3572_v45  ;;  %v1502_v20 = vadd.f32 %v2427_v49, %v3573_v26  ;;  %v3580_v45 = vld [vmem:[#allocation20_spill] sm:$0xff] }
 0x26e   :  { %v1748_v29 = vadd.f32 %v3409_v56, %v1725_v23  ;;  %v1723_v21 = vmul.f32 %v3392_v44, %v1656_v28  ;;  %v1677_v0 = vadd.f32 %v2590_v25, %v1580_v48  ;;  %v1761_v42 = vmax.f32 %v1745_v1, 0.0  ;;  %v3574_v23 = vld [vmem:[#allocation28_spill] sm:$0xff]  ;;  %v3575_v28 = vld [vmem:[#allocation30_spill] sm:$0xff]  ;;  %v2501_v1 = vpop.f32.mrf.mxu0 }
 0x26f   :  { %v1668_v59 = vpop.f32.mrf.mxu1  ;;  %v2430_v48 = vadd.f32 %v3575_v28, %v3574_v23  ;;  %v1599_v37 = vadd.f32 %v2491_v40, %v1502_v20 }
 0x270   :  { %v1764_v54 = vmax.f32 %v1748_v29, 0.0  ;;  %v1746_v57 = vadd.f32 %v3409_v56, %v1723_v21  ;;  %v1669_v50 = vadd.f32 %v1668_v59, %v1572_v53  ;;  %v1728_v3 = vmul.f32 %v3392_v44, %v1677_v0  ;;  %v2502_v49 = vpop.f32.mrf.mxu0 }
 0x271   :  { %v2591_v43 = vpop.f32.mrf.mxu1  ;;  %v2436_v53 = vadd.f32 %v3378_v46, %v3374_v58  ;;  %v1591_v59 = vadd.f32 %v2485_v55, %v1494_v14  ;;  %v3576_v46 = vld [vmem:[#allocation19_spill] sm:$0xff]  ;;  %v2497_v55 = vadd.f32 %v3412_v61, %v3397_v47  ;;  %v2503_v15 = vadd.f32 %v2502_v49, %v2501_v1 }
 0x272   :  { %v1778_v60 = vpack.c.bf16 %v1764_v54, %v1763_v6  ;;  %v1762_v41 = vmax.f32 %v1746_v57, 0.0  ;;  %v1726_v63 = vmul.f32 %v3392_v44, %v1669_v50  ;;  %v1680_v35 = vadd.f32 %v2591_v43, %v1583_v34  ;;  %v3578_v43 = vld [vmem:[#allocation31_spill] sm:$0xff] }
 0x273   :  { %v1671_v11 = vpop.f32.mrf.mxu1  ;;  %v1751_v51 = vadd.f32 %v3409_v56, %v1728_v3  ;;  %v2500_v6 = vadd.f32 %v2499_v24, %v2498_v38  ;;  %v1507_v50 = vadd.f32 %v2430_v48, %v3576_v46  ;;  %v1515_v17 = vadd.f32 %v2436_v53, %v3577_v7 }
 0x274   :  { %v1672_v16 = vadd.f32 %v1671_v11, %v1575_v8  ;;  %v1777_v52 = vpack.c.bf16 %v1762_v41, %v1761_v42  ;;  %v1729_v4 = vmul.f32 %v3392_v44, %v1680_v35  ;;  %v1588_v8 = vadd.f32 %v2482_v32, %v1491_v39 }
 0x275   :  { %v2594_v25 = vpop.f32.mrf.mxu1  ;;  %v1749_v0 = vadd.f32 %v3409_v56, %v1726_v63  ;;  %v1767_v39 = vmax.f32 %v1751_v51, 0.0  ;;  %v2433_v18 = vadd.f32 %v3579_v30, %v3578_v43  ;;  %v2439_v24 = vadd.f32 %v3385_v9, %v3380_v10 }
 0x276   :  { %v1727_v29 = vmul.f32 %v3392_v44, %v1672_v16  ;;  %v1693_v21 = vadd.f32 %v2594_v25, %v1596_v22  ;;  %2616 = vmatprep.mubr.bf16.mxu0 %v1777_v52  ;;  %v1752_v33 = vadd.f32 %v3409_v56, %v1729_v4  ;;  %v1612_v27 = vadd.f32 %v2500_v6, %v1515_v17 }
 0x277   :  { %v1684_v36 = vpop.f32.mrf.mxu1  ;;  %2617 = vmatmul.mubr.bf16.vlgmr.msra.gmra.mxu0 %v1778_v60  ;;  %v1765_v42 = vmax.f32 %v1749_v0, 0.0  ;;  %v1604_v63 = vadd.f32 %v2494_v5, %v1507_v50  ;;  %v1510_v14 = vadd.f32 %v2433_v18, %v3580_v45  ;;  %v1518_v16 = vadd.f32 %v2439_v24, %v3402_v31  ;;  %v3491_v5 = vld [vmem:[%s3541_s8] ss:$0 sm:$0xff]  ;;  %s2869_s8 = smov [#allocation11]  }
 0x278   :  { %v1750_v54 = vadd.f32 %v3409_v56, %v1727_v29  ;;  %v1732_v57 = vmul.f32 %v3392_v44, %v1693_v21  ;;  %v1685_v58 = vadd.f32 %v1684_v36, %v1588_v8  ;;  %v1768_v62 = vmax.f32 %v1752_v33, 0.0 }
 0x279   :  { %v2595_v32 = vpop.f32.mrf.mxu1  ;;  %v1615_v23 = vadd.f32 %v2503_v15, %v1518_v16  ;;  %v1607_v48 = vadd.f32 %v2497_v55, %v1510_v14 }
 0x27a   :  { %v1766_v3 = vmax.f32 %v1750_v54, 0.0  ;;  %v1730_v34 = vmul.f32 %v3392_v44, %v1685_v58  ;;  %v1696_v38 = vadd.f32 %v2595_v32, %v1599_v37  ;;  %v1780_v41 = vpack.c.bf16 %v1768_v62, %v1767_v39  ;;  %v3496_v62 = vld [vmem:[%s3542_s9] ss:$0 sm:$0xff]  ;;  %s2077_s9 = sshll.u32 %s2869_s8, 4  ;;  %s2078_s9 = int_to_ptr.vmem [resolvable:$true] %s2077_s9 }
 0x27b   :  { %v1687_v60 = vpop.f32.mrf.mxu1  ;;  %v1755_v2 = vadd.f32 %v3409_v56, %v1732_v57  ;;  %s2834_s19 = scalar_lea.vmem %s2078_s9, 2048  ;;  %p2839_p7 = scmp.lt.s32.totalorder %s2078_s9, %s2078_s9 }
 0x27c   :  { %v1733_v12 = vmul.f32 %v3392_v44, %v1696_v38  ;;  %v1688_v13 = vadd.f32 %v1687_v60, %v1591_v59  ;;  %v1779_v40 = vpack.c.bf16 %v1766_v3, %v1765_v42  ;;  %v1753_v35 = vadd.f32 %v3409_v56, %v1730_v34  ;;  %p2835_p6 = scmp.ne.s32.totalorder %s2078_s9, %s2834_s19  ;;  %p2840_p8 = scmp.lt.s32.totalorder %s2834_s19, %s2834_s19 }
 0x27d   :  { %v2598_v19 = vpop.f32.mrf.mxu1  ;;  %v1771_v52 = vmax.f32 %v1755_v2, 0.0 }
 0x27e   :  { %v1756_v9 = vadd.f32 %v3409_v56, %v1733_v12  ;;  %v1731_v10 = vmul.f32 %v3392_v44, %v1688_v13  ;;  %v1709_v11 = vadd.f32 %v2598_v19, %v1612_v27  ;;  %2620 = vmatprep.mubr.bf16.mxu0 %v1779_v40  ;;  %v1769_v51 = vmax.f32 %v1753_v35, 0.0  ;;  %v2227_v27 = vld [vmem:[#allocation3 + $0x18] sm:$0xff]   ;;  %p2841_p9 = por %p2840_p8, %p2839_p7 }
 0x27f   :  { %v1700_v22 = vpop.f32.mrf.mxu1  ;;  %2621 = vmatmul.mubr.bf16.gmra.mxu0 %v1780_v41 }
 0x280   :  { %v1772_v26 = vmax.f32 %v1756_v9, 0.0  ;;  %v1754_v47 = vadd.f32 %v3409_v56, %v1731_v10  ;;  %v1701_v61 = vadd.f32 %v1700_v22, %v1604_v63  ;;  %v1736_v20 = vmul.f32 %v3392_v44, %v1709_v11  ;;  %v2226_v63 = vld [vmem:[#allocation3 + $0x10] sm:$0xff]   ;;  %p2842_p10 = pnand %p2841_p9, %p2835_p6 }
 0x281   :  { %v2599_v28 = vpop.f32.mrf.mxu1  ;;  %v2207_v9 = vunpack.c.l.bf16 %v2227_v27  ;;  %v2203_v22 = vunpack.c.l.bf16 %v2226_v63 }
 0x282   :  { %v1782_v4 = vpack.c.bf16 %v1772_v26, %v1771_v52  ;;  %v1770_v25 = vmax.f32 %v1754_v47, 0.0  ;;  %v1734_v53 = vmul.f32 %v3392_v44, %v1701_v61  ;;  %v1712_v1 = vadd.f32 %v2599_v28, %v1615_v23  ;;  %v2229_v28 = vld [vmem:[#allocation3 + $0x28] sm:$0xff]  }
 0x283   :  { %v1703_v31 = vpop.f32.mrf.mxu1  ;;  %v1759_v8 = vadd.f32 %v3409_v56, %v1736_v20  ;;  %v2208_v23 = vunpack.c.h.bf16 %v2227_v27 }
 0x284   :  { %v1704_v29 = vadd.f32 %v1703_v31, %v1607_v48  ;;  %v1781_v21 = vpack.c.bf16 %v1770_v25, %v1769_v51  ;;  %v1737_v0 = vmul.f32 %v3392_v44, %v1712_v1  ;;  %v1757_v33 = vadd.f32 %v3409_v56, %v1734_v53 }
 0x285   :  { %v1775_v6 = vmax.f32 %v1759_v8, 0.0  ;;  %v2204_v51 = vunpack.c.h.bf16 %v2226_v63  ;;  %v2215_v8 = vunpack.c.l.bf16 %v2229_v28 }
 0x286   :  { %v1735_v36 = vmul.f32 %v3392_v44, %v1704_v29  ;;  %2624 = vmatprep.mubr.bf16.mxu1 %v1781_v21  ;;  %v1760_v37 = vadd.f32 %v3409_v56, %v1737_v0  ;;  %v1773_v57 = vmax.f32 %v1757_v33, 0.0  ;;  %v2225_v44 = vld [vmem:[#allocation3 + $0x8] sm:$0xff]   ;;  %v2228_v29 = vld [vmem:[#allocation3 + $0x20] sm:$0xff]  }
 0x287   :  { %2625 = vmatmul.mubr.bf16.vlgmr.msra.gmra.mxu1 %v1782_v4  ;;  %v2199_v7 = vunpack.c.l.bf16 %v2225_v44  ;;  %v2200_v24 = vunpack.c.h.bf16 %v2225_v44 }
 0x288   :  { %v1758_v59 = vadd.f32 %v3409_v56, %v1735_v36  ;;  %v1776_v54 = vmax.f32 %v1760_v37, 0.0  ;;  %v2194_v56 = vld [vmem:[#allocation3] sm:$0xff]  }
 0x289   :  { %v2195_v34 = vunpack.c.l.bf16 %v2194_v56  ;;  %v2196_v60 = vunpack.c.h.bf16 %v2194_v56  ;;  %v2216_v56 = vunpack.c.h.bf16 %v2229_v28 }
 0x28a   :  { %v1774_v58 = vmax.f32 %v1758_v59, 0.0  ;;  %v1784_v46 = vpack.c.bf16 %v1776_v54, %v1775_v6  ;;  %v2211_v54 = vunpack.c.l.bf16 %v2228_v29 }
 0x28c   :  { %v1783_v50 = vpack.c.bf16 %v1774_v58, %v1773_v57 }
 0x28e   :  { %2628 = vmatprep.mubr.bf16.mxu1 %v1783_v50 }
 0x28f   :  { %2629 = vmatmul.mubr.bf16.gmra.mxu1 %v1784_v46 }
 0x337   :  { %v2618_v39 = vpop.f32.mrf.mxu0 }
 0x338   :  { %v1955_v32 = vmul.f32 %v2618_v39, %v3491_v5 }
 0x339   :  { %v1883_v17 = vpop.f32.mrf.mxu0 }
 0x33a   :  { %v1978_v49 = vadd.f32 %v3496_v62, %v1955_v32  ;;  %v1953_v3 = vmul.f32 %v3491_v5, %v1883_v17  ;;  %v2231_v32 = vld [vmem:[#allocation3 + $0x38] sm:$0xff]  }
 0x33b   :  { %v2619_v38 = vpop.f32.mrf.mxu0  ;;  %v2224_v63 = vunpack.c.h.bf16 %v2231_v32 }
 0x33c   :  { %v2026_v43 = vadd.f32 %v2199_v7, %v1978_v49  ;;  %v1976_v30 = vadd.f32 %v3496_v62, %v1953_v3  ;;  %v1956_v18 = vmul.f32 %v2619_v38, %v3491_v5  ;;  %v2212_v49 = vunpack.c.h.bf16 %v2228_v29 }
 0x33d   :  { %v1886_v42 = vpop.f32.mrf.mxu0 }
 0x33e   :  { %v2042_v41 = vmax.f32 %v2026_v43, 0.0  ;;  %v2024_v2 = vadd.f32 %v2195_v34, %v1976_v30  ;;  %v1979_v12 = vadd.f32 %v3496_v62, %v1956_v18  ;;  %v1954_v13 = vmul.f32 %v3491_v5, %v1886_v42  ;;  %v2230_v30 = vld [vmem:[#allocation3 + $0x30] sm:$0xff]  }
 0x33f   :  { %v2622_v40 = vpop.f32.mrf.mxu0 }
 0x340   :  { %2058 = vst [vmem:[#allocation11 + $0x10] sm:$0xff] %v2042_v41  ;;  %v2040_v55 = vmax.f32 %v2024_v2, 0.0  ;;  %v2027_v15 = vadd.f32 %v2200_v24, %v1979_v12  ;;  %v1977_v19 = vadd.f32 %v3496_v62, %v1954_v13  ;;  %v1959_v35 = vmul.f32 %v2622_v40, %v3491_v5 }
 0x341   :  { %v1899_v45 = vpop.f32.mrf.mxu0  ;;  %v2223_v24 = vunpack.c.l.bf16 %v2231_v32  ;;  %v2219_v13 = vunpack.c.l.bf16 %v2230_v30 }
 0x342   :  { %2056 = vst [vmem:[#allocation11] sm:$0xff] %v2040_v55  ;;  %v2043_v10 = vmax.f32 %v2027_v15, 0.0  ;;  %v2025_v11 = vadd.f32 %v2196_v60, %v1977_v19  ;;  %v1982_v14 = vadd.f32 %v3496_v62, %v1959_v35  ;;  %v1957_v16 = vmul.f32 %v3491_v5, %v1899_v45 }
 0x343   :  { %v2623_v26 = vpop.f32.mrf.mxu0 }
 0x344   :  { %2059 = vst [vmem:[#allocation11 + $0x18] sm:$0xff] %v2043_v10  ;;  %v2041_v52 = vmax.f32 %v2025_v11, 0.0  ;;  %v2030_v47 = vadd.f32 %v2207_v9, %v1982_v14  ;;  %v1980_v61 = vadd.f32 %v3496_v62, %v1957_v16  ;;  %v1960_v20 = vmul.f32 %v2623_v26, %v3491_v5 }
 0x345   :  { %v1902_v48 = vpop.f32.mrf.mxu0  ;;  %v2220_v14 = vunpack.c.h.bf16 %v2230_v30 }
 0x346   :  { %2057 = vst [vmem:[#allocation11 + $0x8] sm:$0xff] %v2041_v52  ;;  %v2046_v4 = vmax.f32 %v2030_v47, 0.0  ;;  %v2028_v25 = vadd.f32 %v2203_v22, %v1980_v61  ;;  %v1983_v53 = vadd.f32 %v3496_v62, %v1960_v20  ;;  %v1958_v1 = vmul.f32 %v3491_v5, %v1902_v48 }
 0x347   :  { %v2626_v31 = vpop.f32.mrf.mxu1 }
 0x348   :  { %v1963_v21 = vmul.f32 %v2626_v31, %v3491_v5  ;;  %2062 = vst [vmem:[#allocation11 + $0x30] sm:$0xff] %v2046_v4  ;;  %v2044_v0 = vmax.f32 %v2028_v25, 0.0  ;;  %v2031_v33 = vadd.f32 %v2208_v23, %v1983_v53  ;;  %v1981_v36 = vadd.f32 %v3496_v62, %v1958_v1 }
 0x349   :  { %v1915_v37 = vpop.f32.mrf.mxu1 }
 0x34a   :  { %v1986_v59 = vadd.f32 %v3496_v62, %v1963_v21  ;;  %v1961_v6 = vmul.f32 %v3491_v5, %v1915_v37  ;;  %2060 = vst [vmem:[#allocation11 + $0x20] sm:$0xff] %v2044_v0  ;;  %v2047_v57 = vmax.f32 %v2031_v33, 0.0  ;;  %v2029_v58 = vadd.f32 %v2204_v51, %v1981_v36 }
 0x34b   :  { %v2627_v46 = vpop.f32.mrf.mxu1 }
 0x34c   :  { %v2034_v50 = vadd.f32 %v2215_v8, %v1986_v59  ;;  %v1984_v44 = vadd.f32 %v3496_v62, %v1961_v6  ;;  %v1964_v39 = vmul.f32 %v2627_v46, %v3491_v5  ;;  %2063 = vst [vmem:[#allocation11 + $0x38] sm:$0xff] %v2047_v57  ;;  %v2045_v7 = vmax.f32 %v2029_v58, 0.0 }
 0x34d   :  { %v1918_v17 = vpop.f32.mrf.mxu1 }
 0x34e   :  { %v2050_v3 = vmax.f32 %v2034_v50, 0.0  ;;  %v2032_v34 = vadd.f32 %v2211_v54, %v1984_v44  ;;  %v1987_v38 = vadd.f32 %v3496_v62, %v1964_v39  ;;  %v1962_v43 = vmul.f32 %v3491_v5, %v1918_v17  ;;  %2061 = vst [vmem:[#allocation11 + $0x28] sm:$0xff] %v2045_v7 }
 0x34f   :  { %v2630_v18 = vpop.f32.mrf.mxu1 }
 0x350   :  { %2066 = vst [vmem:[#allocation11 + $0x50] sm:$0xff] %v2050_v3  ;;  %v2048_v42 = vmax.f32 %v2032_v34, 0.0  ;;  %v2035_v60 = vadd.f32 %v2216_v56, %v1987_v38  ;;  %v1985_v41 = vadd.f32 %v3496_v62, %v1962_v43  ;;  %v1967_v2 = vmul.f32 %v2630_v18, %v3491_v5 }
 0x351   :  { %v1931_v12 = vpop.f32.mrf.mxu1 }
 0x352   :  { %2064 = vst [vmem:[#allocation11 + $0x40] sm:$0xff] %v2048_v42  ;;  %v2051_v27 = vmax.f32 %v2035_v60, 0.0  ;;  %v2033_v55 = vadd.f32 %v2212_v49, %v1985_v41  ;;  %v1990_v15 = vadd.f32 %v3496_v62, %v1967_v2  ;;  %v1965_v19 = vmul.f32 %v3491_v5, %v1931_v12 }
 0x353   :  { %v2631_v40 = vpop.f32.mrf.mxu1 }
 0x354   :  { %2067 = vst [vmem:[#allocation11 + $0x58] sm:$0xff] %v2051_v27  ;;  %v2049_v35 = vmax.f32 %v2033_v55, 0.0  ;;  %v2038_v9 = vadd.f32 %v2223_v24, %v1990_v15  ;;  %v1988_v10 = vadd.f32 %v3496_v62, %v1965_v19  ;;  %v1968_v11 = vmul.f32 %v2631_v40, %v3491_v5 }
 0x355   :  { %v1934_v45 = vpop.f32.mrf.mxu1 }
 0x356   :  { %2065 = vst [vmem:[#allocation11 + $0x48] sm:$0xff] %v2049_v35  ;;  %v2054_v16 = vmax.f32 %v2038_v9, 0.0  ;;  %v2036_v22 = vadd.f32 %v2219_v13, %v1988_v10  ;;  %v1991_v52 = vadd.f32 %v3496_v62, %v1968_v11  ;;  %v1966_v26 = vmul.f32 %v3491_v5, %v1934_v45 }
 0x358   :  { %2070 = vst [vmem:[#allocation11 + $0x70] sm:$0xff] %v2054_v16  ;;  %v2052_v47 = vmax.f32 %v2036_v22, 0.0  ;;  %v2039_v61 = vadd.f32 %v2224_v63, %v1991_v52  ;;  %v1989_v20 = vadd.f32 %v3496_v62, %v1966_v26 }
 0x35a   :  { %2068 = vst [vmem:[#allocation11 + $0x60] sm:$0xff] %v2052_v47  ;;  %v2055_v23 = vmax.f32 %v2039_v61, 0.0  ;;  %v2037_v28 = vadd.f32 %v2220_v14, %v1989_v20 }
 0x35c   :  { %2071 = vst [vmem:[#allocation11 + $0x78] sm:$0xff] %v2055_v23  ;;  %v2053_v48 = vmax.f32 %v2037_v28, 0.0 }
 0x35e   :  { %2069 = vst [vmem:[#allocation11 + $0x68] sm:$0xff] %v2053_v48 }
 0x35f   :  { %2845 = shalt.err (!%p2842_p10)
}
 0x360   :  { %s2870_s20 = smov 128   ;;  %s2871_s21 = smov 8  }
 0x361   :  { %2083 = dma.vmem_to_hbm [thread:$0]  %s2078_s9, 2048, %s3543_s10, [#allocation5], %s2870_s20, %s2870_s20, %s2871_s21  }
 0x362   :  { %2860 = dma.done.wait [#allocation5], 2048  }
 0x363   :  { %2861 = vsyncadd [#allocation5], 4294965248 }
 0x364   :  { %2087 = vsyncpa [#allocation4], 1 }
 0x365   :  { %2088 = vsyncpa [#allocation7], 1 }
 0x366   :  { %2089 = vsyncpa [#allocation10], 1 }
 0x367   :  { %2090 = vsyncpa [#allocation5], 1 }

</bundles_post_ra>
